<compile_context>
chip_gen: v7x
topology: tpu7x:2x2x1
jax: 0.10.0
libtpu: 0.0.40
codegen_flags: <defaults>
</compile_context>

<pallas_src>
import functools

import jax
import jax.numpy as jnp
from jax.experimental import pallas as pl
from jax.experimental.pallas import tpu as pltpu


# ------------------------------- kernels ------------------------------------

def _silu(x):
    # silu(x) = x*sigmoid(x) = 0.5*x*(1 + tanh(0.5*x)): one EUP op per element.
    return 0.5 * x * (1.0 + jnp.tanh(0.5 * x))


def _cv1b_sum_kernel(x_ref, w1b_ref, t1b_ref, bsum_ref):
    """Pass 1: `b` half of cv1 for one HW tile + spatial-sum accumulation
    (for the SE global-average pool).  x/w1b are bf16, accumulation in f32."""
    @pl.when(pl.program_id(2) == 0)
    def _init():
        bsum_ref[...] = jnp.zeros_like(bsum_ref)

    b = _silu(jnp.dot(w1b_ref[...], x_ref[...],
                      preferred_element_type=jnp.float32) + t1b_ref[...])
    bsum_ref[...] += jnp.sum(b, axis=1, keepdims=True)      # (c, 1)


def _psa_main_kernel(x_ref, gate_ref, w1_ref, wf1_ref, wf2_ref,
                     w2a_ref, w2b_ref, shifts_ref, o_ref, *, c, c1):
    """Pass 2: cv1 -> (precomputed) SE gate -> ffn -> residual -> cv2 for one
    (C1, thw) tile."""
    shifts = shifts_ref[...]                                 # (5c + c1, 1) f32
    t1 = shifts[0:2 * c, :]
    tf1 = shifts[2 * c:4 * c, :]
    tf2 = shifts[4 * c:5 * c, :]
    t2 = shifts[5 * c:5 * c + c1, :]

    x = x_ref[...]                                           # (C1, thw) bf16

    # cv1: conv + folded BN + SiLU, single dot over both output halves.
    ab = _silu(jnp.dot(w1_ref[...], x, preferred_element_type=jnp.float32) + t1)
    a = ab[:c, :].astype(jnp.bfloat16)                       # (c, thw) bf16, only needed by cv2
    b = ab[c:, :]                                            # (c, thw) f32

    # SELayerV2: gate precomputed per image in the wrapper; gate_ref == 1 + sigmoid(...)
    b = b * gate_ref[...]

    # ffn: Conv(c, 2c, SiLU) -> Conv(2c, c, no act), residual.
    h = _silu(jnp.dot(wf1_ref[...], b.astype(jnp.bfloat16),
                      preferred_element_type=jnp.float32) + tf1)               # (2c, thw)
    f = jnp.dot(wf2_ref[...], h.astype(jnp.bfloat16),
                preferred_element_type=jnp.float32) + tf2                      # (c, thw)
    b = (b + f).astype(jnp.bfloat16)

    # cv2 on [a | b] without materializing a concat: two K=c dots.
    z = (jnp.dot(w2a_ref[...], a, preferred_element_type=jnp.float32)
         + jnp.dot(w2b_ref[...], b, preferred_element_type=jnp.float32)
         + t2)                                                                 # (C1, thw)
    o_ref[...] = _silu(z)


# ------------------------------- wrapper ------------------------------------

def _vmem_limit_bytes():
    """Generation-aware VMEM request: ~3/4 of physical (64 MiB v7x, 128 MiB v5e/v6e)."""
    cap = 128 * 1024 * 1024
    try:
        cap = int(getattr(pltpu.get_tpu_info(), "vmem_capacity_bytes", cap))
    except Exception:
        pass
    return max(32 * 1024 * 1024, min(96 * 1024 * 1024, (cap * 3) // 4))


def _pick_hw_tile(hw_pad, c1, vmem_limit, max_tile=2048):
    """Largest multiple of 128 dividing hw_pad, capped by a rough per-column
    VMEM footprint estimate for pass 2 (x/out double buffers + f32 temps)."""
    per_col = 36 * c1                       # bytes per HW column (rough, conservative)
    cap = (vmem_limit // 2) // max(per_col, 1)
    cap = max(128, min(max_tile, (cap // 128) * 128))
    t = min(cap, hw_pad)
    t = max(128, (t // 128) * 128)
    while hw_pad % t != 0:
        t -= 128
    return t


def psa_senetv2(x_nchw, params, *, e=0.5, reduction=16, hw_tile=None):
    """Fused PSASENetV2 forward.  x_nchw: (B, C1, H, W) -> (B, C1, H, W) f32."""
    B, C1, H, W = x_nchw.shape
    HW = H * W
    c = int(C1 * e)
    T = 5 * c + C1

    vmem_limit = _vmem_limit_bytes()

    # Pad HW to a multiple of 128 so every store is lane-dense.
    HW_pad = ((HW + 127) // 128) * 128
    n_pad = HW_pad - HW

    thw = hw_tile if hw_tile is not None else _pick_hw_tile(HW_pad, C1, vmem_limit)
    assert HW_pad % thw == 0 and thw % 128 == 0
    n_hw = HW_pad // thw

    # Cast x to bf16 once (a producer could also feed bf16 directly); both
    # passes then read only bf16 from HBM.
    x = x_nchw.reshape(B, C1, HW)                            # free: no transpose
    if x.dtype != jnp.bfloat16:
        x = x.astype(jnp.bfloat16)
    if n_pad:
        x = jnp.pad(x, ((0, 0), (0, 0), (0, n_pad)))

    # bf16 weights for the MXU; shifts / tiny SE weights stay f32.
    w1 = params["w1"].astype(jnp.bfloat16)                   # (2c, C1)
    wf1 = params["wf1"].astype(jnp.bfloat16)                 # (2c, c)
    wf2 = params["wf2"].astype(jnp.bfloat16)                 # (c, 2c)
    w2 = params["w2"].astype(jnp.bfloat16)                   # (C1, 2c)
    w2a, w2b = w2[:, :c], w2[:, c:]                          # pre-split: no in-kernel concat
    shifts = params["shifts"]                                # (T, 1) f32
    w1b = w1[c:, :]                                          # pass 1 only needs the b half
    t1b = shifts[c:2 * c, :]

    # ---------------- Pass 1: SE global-average accumulation -----------------
    # Extra "parallel" HW split so both v7x TensorCores run pass 1 at B == 1.
    split = 2 if (n_hw % 2 == 0 and n_hw >= 2) else 1
    hw_per_split = n_hw // split

    x_spec1 = pl.BlockSpec((pl.Squeezed(), C1, thw),
                           lambda b, s, h: (b, 0, s * hw_per_split + h))
    bsum_spec = pl.BlockSpec((pl.Squeezed(), pl.Squeezed(), c, 1),
                             lambda b, s, h: (b, s, 0, 0))

    def full1(shape):
        nd = len(shape)
        return pl.BlockSpec(shape, lambda b, s, h, _nd=nd: (0,) * _nd)

    bsum_part = pl.pallas_call(
        _cv1b_sum_kernel,
        out_shape=jax.ShapeDtypeStruct((B, split, c, 1), jnp.float32),
        grid=(B, split, hw_per_split),
        in_specs=[x_spec1, full1((c, C1)), full1((c, 1))],
        out_specs=bsum_spec,
        compiler_params=pltpu.CompilerParams(
            dimension_semantics=("parallel", "parallel", "arbitrary"),
            vmem_limit_bytes=vmem_limit),
    )(x, w1b, t1b)

    # ------------- SE gate once per image (tiny, plain JAX) ------------------
    bsum = jnp.sum(bsum_part, axis=1)                        # (B, c, 1)
    if n_pad:
        # zero-padded pixels contribute exactly silu(t1b) each -> subtract.
        pad_b = t1b * jax.nn.sigmoid(t1b)                    # (c, 1)
        bsum = bsum - float(n_pad) * pad_b[None]
    y = bsum[..., 0] * (1.0 / HW)                            # (B, c) global avg pool
    yc = jnp.maximum(jnp.einsum('bc,cj->bj', y, params["wcat_t"]), 0.0)   # (B, 4c/r)
    gate = 1.0 + jax.nn.sigmoid(jnp.einsum('bj,cj->bc', yc, params["wfc"]))
    gate = gate[..., None]                                   # (B, c, 1), includes the +1 residual

    # ---------------- Pass 2: cv1 -> gate -> ffn -> cv2 ----------------------
    x_spec2 = pl.BlockSpec((pl.Squeezed(), C1, thw), lambda b, h: (b, 0, h))
    gate_spec = pl.BlockSpec((pl.Squeezed(), c, 1), lambda b, h: (b, 0, 0))

    def full2(shape):
        nd = len(shape)
        return pl.BlockSpec(shape, lambda b, h, _nd=nd: (0,) * _nd)

    out = pl.pallas_call(
        functools.partial(_psa_main_kernel, c=c, c1=C1),
        out_shape=jax.ShapeDtypeStruct((B, C1, HW_pad), jnp.float32),
        grid=(B, n_hw),
        in_specs=[x_spec2, gate_spec,
                  full2((2 * c, C1)), full2((2 * c, c)), full2((c, 2 * c)),
                  full2((C1, c)), full2((C1, c)), full2((T, 1))],
        out_specs=x_spec2,
        compiler_params=pltpu.CompilerParams(
            dimension_semantics=("parallel", "parallel"),
            vmem_limit_bytes=vmem_limit),
    )(x, gate, w1, wf1, wf2, w2a, w2b, shifts)

    if n_pad:
        out = out[:, :, :HW]
    return out.reshape(B, C1, H, W)


# ----------------------------- parameter setup ------------------------------

def make_params(key, c1, e=0.5, reduction=16):
    """Synthetic PSASENetV2 parameters with eval-mode BatchNorm pre-folded.

      w1 (2c,c1)  wf1 (2c,c)  wf2 (c,2c)  w2 (c1,2c)   -- weight * BN scale
      wcat_t (c, 4*c//r)  SE fc1..4 weights transposed & stacked
      wfc    (c, 4*c//r)  SE final fc weight
      shifts (5c+c1, 1)   packed BN shifts [t1 | tf1 | tf2 | t2]
    """
    c = int(c1 * e)
    assert c >= reduction and c % reduction == 0, "invalid channel count for SELayerV2"
    cr = c // reduction
    keys = iter(jax.random.split(key, 32))

    def conv_w(cout, cin):
        return jax.random.normal(next(keys), (cout, cin), jnp.float32) / jnp.sqrt(float(cin))

    def bn(cout, eps=1e-5):
        gamma = 0.5 + jax.random.uniform(next(keys), (cout,), jnp.float32)
        beta = 0.1 * jax.random.normal(next(keys), (cout,), jnp.float32)
        mean = 0.1 * jax.random.normal(next(keys), (cout,), jnp.float32)
        var = 0.5 + jax.random.uniform(next(keys), (cout,), jnp.float32)
        scale = gamma / jnp.sqrt(var + eps)
        return scale, beta - mean * scale

    s1, t1 = bn(2 * c)
    w1 = conv_w(2 * c, c1) * s1[:, None]
    sf1, tf1 = bn(2 * c)
    wf1 = conv_w(2 * c, c) * sf1[:, None]
    sf2, tf2 = bn(c)
    wf2 = conv_w(c, 2 * c) * sf2[:, None]
    s2, t2 = bn(c1)
    w2 = conv_w(c1, 2 * c) * s2[:, None]

    fc_i = [0.3 * jax.random.normal(next(keys), (cr, c), jnp.float32) for _ in range(4)]
    wcat_t = jnp.concatenate([w.T for w in fc_i], axis=1)    # (c, 4cr)
    wfc = 0.3 * jax.random.normal(next(keys), (c, 4 * cr), jnp.float32)

    shifts = jnp.concatenate([t1, tf1, tf2, t2])[:, None]
    return dict(w1=w1, wf1=wf1, wf2=wf2, w2=w2, wcat_t=wcat_t, wfc=wfc, shifts=shifts)


# ------------------------------ plain-JAX ref --------------------------------

def ref_forward(x_nchw, p, *, e=0.5, mirror_bf16=True):
    """Plain-JAX reference.  mirror_bf16 rounds dot operands to bf16 like the kernel."""
    B, C1, H, W = x_nchw.shape
    c = int(C1 * e)
    x = x_nchw.reshape(B, C1, H * W).astype(jnp.float32)
    lo = (lambda v: v.astype(jnp.bfloat16).astype(jnp.float32)) if mirror_bf16 else (lambda v: v)
    dot = functools.partial(jnp.einsum, precision=jax.lax.Precision.HIGHEST)
    sig = jax.nn.sigmoid
    silu = lambda v: v * sig(v)

    s = p["shifts"][:, 0]
    t1, tf1 = s[:2 * c], s[2 * c:4 * c]
    tf2, t2 = s[4 * c:5 * c], s[5 * c:5 * c + C1]

    ab = silu(dot('oc,bcp->bop', lo(p["w1"]), lo(x)) + t1[None, :, None])
    a, b = ab[:, :c], ab[:, c:]
    y = jnp.mean(b, axis=2)                                   # (B, c)
    yc = jnp.maximum(dot('cj,bc->bj', p["wcat_t"], y), 0.0)   # (B, 4cr)
    gate = sig(dot('cj,bj->bc', p["wfc"], yc))                # (B, c)
    b = b * (1.0 + gate[:, :, None])
    h = silu(dot('oc,bcp->bop', lo(p["wf1"]), lo(b)) + tf1[None, :, None])
    f = dot('oc,bcp->bop', lo(p["wf2"]), lo(h)) + tf2[None, :, None]
    b = b + f
    z = dot('oc,bcp->bop', lo(p["w2"]), lo(jnp.concatenate([a, b], axis=1))) + t2[None, :, None]
    return silu(z).reshape(B, C1, H, W)


# ---------------------------------- main -------------------------------------

if __name__ == "__main__":
    key = jax.random.PRNGKey(0)
    kx, kp, kx2 = jax.random.split(key, 3)

    # SELayerV2 requires c >= 16 and c % 16 == 0 -> smallest case: C1=32, e=0.5.
    B, C1, H, W = 2, 32, 16, 16
    x = jax.random.normal(kx, (B, C1, H, W), jnp.float32)
    params = make_params(kp, C1, e=0.5, reduction=16)

    # hw_tile=128 -> 2 HW tiles per image: exercises the pass-1 core-parallel
    # split + cross-tile mean accumulation and the (B, HW-tile) grid of pass 2.
    fwd = jax.jit(functools.partial(psa_senetv2, hw_tile=128))
    out = jax.block_until_ready(fwd(x, params))
    ref = jax.block_until_ready(ref_forward(x, params))
    assert out.shape == (B, C1, H, W)
    err = float(jnp.max(jnp.abs(out - ref)))
    assert jnp.allclose(out, ref, atol=5e-2, rtol=5e-2), f"max abs err {err}"

    # Ragged spatial size (HW=100): exercises the pad-to-128 path and the
    # exact SE-mean correction for the zero-padded pixels.
    H2 = W2 = 10
    x2 = jax.random.normal(kx2, (B, C1, H2, W2), jnp.float32)
    out2 = jax.block_until_ready(jax.jit(psa_senetv2)(x2, params))
    ref2 = jax.block_until_ready(ref_forward(x2, params))
    assert out2.shape == (B, C1, H2, W2)
    err2 = float(jnp.max(jnp.abs(out2 - ref2)))
    assert jnp.allclose(out2, ref2, atol=5e-2, rtol=5e-2), f"max abs err {err2}"

    print("KERNEL_OK")
</pallas_src>

<mosaic_0001>
module attributes {stable_mosaic.version = 11 : i64} {
  func.func @_cv1b_sum_kernel(%arg0: i32, %arg1: i32, %arg2: i32, %arg3: memref<1x32x128xbf16, #tpu.memory_space<vmem>>, %arg4: memref<16x32xbf16, #tpu.memory_space<vmem>>, %arg5: memref<16x1xf32, #tpu.memory_space<vmem>>, %arg6: memref<1x1x16x1xf32, #tpu.memory_space<vmem>>) attributes {dimension_semantics = [#tpu.dimension_semantics<parallel>, #tpu.dimension_semantics<parallel>, #tpu.dimension_semantics<arbitrary>], iteration_bounds = array<i64: 2, 2, 1>, scalar_prefetch = 0 : i64, scratch_operands = 0 : i64, tpu.core_type = #tpu.core_type<tc>, window_params = [{transform_indices = @transform_0, window_bounds = array<i64: 1, 32, 128>}, {pipeline_mode = #tpu.pipeline_mode<synchronous>, transform_indices = @transform_1, window_bounds = array<i64: 16, 32>}, {pipeline_mode = #tpu.pipeline_mode<synchronous>, transform_indices = @transform_2, window_bounds = array<i64: 16, 1>}, {transform_indices = @transform_3, window_bounds = array<i64: 1, 1, 16, 1>}]} {
    %c0_i32 = arith.constant 0 : i32
    %0 = arith.cmpi eq, %arg2, %c0_i32 : i32
    %1 = arith.extui %0 : i1 to i32
    %c0_i32_0 = arith.constant 0 : i32
    %2 = arith.cmpi ne, %1, %c0_i32_0 : i32
    scf.if %2 {
      %cst_19 = arith.constant 0.000000e+00 : f32
      %26 = vector.broadcast %cst_19 : f32 to vector<16x1xf32>
      %c0_20 = arith.constant 0 : index
      %c0_21 = arith.constant 0 : index
      %c0_22 = arith.constant 0 : index
      %c0_23 = arith.constant 0 : index
      %27 = vector.load %arg6[%c0_20, %c0_21, %c0_22, %c0_23] : memref<1x1x16x1xf32, #tpu.memory_space<vmem>>, vector<1x1x16x1xf32>
      %28 = vector.shape_cast %27 : vector<1x1x16x1xf32> to vector<16x1xf32>
      %29 = vector.shape_cast %26 : vector<16x1xf32> to vector<1x1x16x1xf32>
      tpu.vector_store %arg6[%c0_20, %c0_21, %c0_22, %c0_23], %29 {strides = array<i32>} : memref<1x1x16x1xf32, #tpu.memory_space<vmem>>, vector<1x1x16x1xf32>,
    } else {
    }
    %c0 = arith.constant 0 : index
    %c0_1 = arith.constant 0 : index
    %3 = vector.load %arg4[%c0, %c0_1] : memref<16x32xbf16, #tpu.memory_space<vmem>>, vector<16x32xbf16>
    %c0_2 = arith.constant 0 : index
    %c0_3 = arith.constant 0 : index
    %c0_4 = arith.constant 0 : index
    %4 = vector.load %arg3[%c0_2, %c0_3, %c0_4] : memref<1x32x128xbf16, #tpu.memory_space<vmem>>, vector<1x32x128xbf16>
    %5 = vector.shape_cast %4 : vector<1x32x128xbf16> to vector<32x128xbf16>
    %cst = arith.constant dense<0.000000e+00> : vector<16x128xf32>
    %6 = tpu.matmul %3, %5, %cst {dimension_numbers = #tpu.dot_dimension_numbers<[1], [0], [0], [1], [0, 0, 1, 1], [], []>} : vector<16x32xbf16>, vector<32x128xbf16>, vector<16x128xf32> -> vector<16x128xf32>
    %c0_5 = arith.constant 0 : index
    %c0_6 = arith.constant 0 : index
    %7 = vector.load %arg5[%c0_5, %c0_6] : memref<16x1xf32, #tpu.memory_space<vmem>>, vector<16x1xf32>
    %8 = vector.broadcast %7 : vector<16x1xf32> to vector<16x128xf32>
    %9 = arith.addf %6, %8 : vector<16x128xf32>
    %cst_7 = arith.constant 5.000000e-01 : f32
    %10 = vector.broadcast %cst_7 : f32 to vector<16x128xf32>
    %11 = arith.mulf %10, %9 : vector<16x128xf32>
    %cst_8 = arith.constant 5.000000e-01 : f32
    %12 = vector.broadcast %cst_8 : f32 to vector<16x128xf32>
    %13 = arith.mulf %12, %9 : vector<16x128xf32>
    %14 = math.tanh %13 : vector<16x128xf32>
    %cst_9 = arith.constant 1.000000e+00 : f32
    %15 = vector.broadcast %cst_9 : f32 to vector<16x128xf32>
    %16 = arith.addf %15, %14 : vector<16x128xf32>
    %17 = arith.mulf %11, %16 : vector<16x128xf32>
    %c0_10 = arith.constant 0 : index
    %c0_11 = arith.constant 0 : index
    %c0_12 = arith.constant 0 : index
    %c0_13 = arith.constant 0 : index
    %18 = vector.load %arg6[%c0_10, %c0_11, %c0_12, %c0_13] : memref<1x1x16x1xf32, #tpu.memory_space<vmem>>, vector<1x1x16x1xf32>
    %19 = vector.shape_cast %18 : vector<1x1x16x1xf32> to vector<16x1xf32>
    %cst_14 = arith.constant dense<0.000000e+00> : vector<16xf32>
    %20 = vector.multi_reduction <add>, %17, %cst_14 [1] : vector<16x128xf32> to vector<16xf32>
    %21 = vector.shape_cast %20 : vector<16xf32> to vector<16x1xf32>
    %22 = arith.addf %19, %21 : vector<16x1xf32>
    %c0_15 = arith.constant 0 : index
    %c0_16 = arith.constant 0 : index
    %c0_17 = arith.constant 0 : index
    %c0_18 = arith.constant 0 : index
    %23 = vector.load %arg6[%c0_15, %c0_16, %c0_17, %c0_18] : memref<1x1x16x1xf32, #tpu.memory_space<vmem>>, vector<1x1x16x1xf32>
    %24 = vector.shape_cast %23 : vector<1x1x16x1xf32> to vector<16x1xf32>
    %25 = vector.shape_cast %22 : vector<16x1xf32> to vector<1x1x16x1xf32>
    tpu.vector_store %arg6[%c0_15, %c0_16, %c0_17, %c0_18], %25 {strides = array<i32>} : memref<1x1x16x1xf32, #tpu.memory_space<vmem>>, vector<1x1x16x1xf32>,
    return
  }
  func.func @transform_0(%arg0: i32, %arg1: i32, %arg2: i32) -> (i32, i32, i32) {
    %c1_i32 = arith.constant 1 : i32
    %0 = arith.muli %arg1, %c1_i32 : i32
    %1 = arith.addi %0, %arg2 : i32
    %c0_i32 = arith.constant 0 : i32
    %c0_i32_0 = arith.constant 0 : i32
    return %arg0, %c0_i32, %1 : i32, i32, i32
  }
  func.func @transform_1(%arg0: i32, %arg1: i32, %arg2: i32) -> (i32, i32) {
    %c0_i32 = arith.constant 0 : i32
    %c0_i32_0 = arith.constant 0 : i32
    %c0_i32_1 = arith.constant 0 : i32
    return %c0_i32, %c0_i32_0 : i32, i32
  }
  func.func @transform_2(%arg0: i32, %arg1: i32, %arg2: i32) -> (i32, i32) {
    %c0_i32 = arith.constant 0 : i32
    %c0_i32_0 = arith.constant 0 : i32
    %c0_i32_1 = arith.constant 0 : i32
    return %c0_i32, %c0_i32_0 : i32, i32
  }
  func.func @transform_3(%arg0: i32, %arg1: i32, %arg2: i32) -> (i32, i32, i32, i32) {
    %c0_i32 = arith.constant 0 : i32
    %c0_i32_0 = arith.constant 0 : i32
    %c0_i32_1 = arith.constant 0 : i32
    return %arg0, %arg1, %c0_i32, %c0_i32_0 : i32, i32, i32, i32
  }
}

module attributes {stable_mosaic.version = 11 : i64} {
  func.func @_psa_main_kernel(%arg0: i32, %arg1: i32, %arg2: memref<1x32x128xbf16, #tpu.memory_space<vmem>>, %arg3: memref<1x16x1xf32, #tpu.memory_space<vmem>>, %arg4: memref<32x32xbf16, #tpu.memory_space<vmem>>, %arg5: memref<32x16xbf16, #tpu.memory_space<vmem>>, %arg6: memref<16x32xbf16, #tpu.memory_space<vmem>>, %arg7: memref<32x16xbf16, #tpu.memory_space<vmem>>, %arg8: memref<32x16xbf16, #tpu.memory_space<vmem>>, %arg9: memref<112x1xf32, #tpu.memory_space<vmem>>, %arg10: memref<1x32x128xf32, #tpu.memory_space<vmem>>) attributes {dimension_semantics = [#tpu.dimension_semantics<parallel>, #tpu.dimension_semantics<parallel>], iteration_bounds = array<i64: 2, 2>, scalar_prefetch = 0 : i64, scratch_operands = 0 : i64, tpu.core_type = #tpu.core_type<tc>, window_params = [{transform_indices = @transform_0, window_bounds = array<i64: 1, 32, 128>}, {transform_indices = @transform_1, window_bounds = array<i64: 1, 16, 1>}, {pipeline_mode = #tpu.pipeline_mode<synchronous>, transform_indices = @transform_2, window_bounds = array<i64: 32, 32>}, {pipeline_mode = #tpu.pipeline_mode<synchronous>, transform_indices = @transform_3, window_bounds = array<i64: 32, 16>}, {pipeline_mode = #tpu.pipeline_mode<synchronous>, transform_indices = @transform_4, window_bounds = array<i64: 16, 32>}, {pipeline_mode = #tpu.pipeline_mode<synchronous>, transform_indices = @transform_5, window_bounds = array<i64: 32, 16>}, {pipeline_mode = #tpu.pipeline_mode<synchronous>, transform_indices = @transform_6, window_bounds = array<i64: 32, 16>}, {pipeline_mode = #tpu.pipeline_mode<synchronous>, transform_indices = @transform_7, window_bounds = array<i64: 112, 1>}, {transform_indices = @transform_8, window_bounds = array<i64: 1, 32, 128>}]} {
    %c0 = arith.constant 0 : index
    %c0_0 = arith.constant 0 : index
    %0 = vector.load %arg9[%c0, %c0_0] : memref<112x1xf32, #tpu.memory_space<vmem>>, vector<112x1xf32>
    %1 = vector.extract_strided_slice %0 {offsets = [0, 0], sizes = [32, 1], strides = [1, 1]} : vector<112x1xf32> to vector<32x1xf32>
    %2 = vector.extract_strided_slice %0 {offsets = [32, 0], sizes = [32, 1], strides = [1, 1]} : vector<112x1xf32> to vector<32x1xf32>
    %3 = vector.extract_strided_slice %0 {offsets = [64, 0], sizes = [16, 1], strides = [1, 1]} : vector<112x1xf32> to vector<16x1xf32>
    %4 = vector.extract_strided_slice %0 {offsets = [80, 0], sizes = [32, 1], strides = [1, 1]} : vector<112x1xf32> to vector<32x1xf32>
    %c0_1 = arith.constant 0 : index
    %c0_2 = arith.constant 0 : index
    %c0_3 = arith.constant 0 : index
    %5 = vector.load %arg2[%c0_1, %c0_2, %c0_3] : memref<1x32x128xbf16, #tpu.memory_space<vmem>>, vector<1x32x128xbf16>
    %6 = vector.shape_cast %5 : vector<1x32x128xbf16> to vector<32x128xbf16>
    %c0_4 = arith.constant 0 : index
    %c0_5 = arith.constant 0 : index
    %7 = vector.load %arg4[%c0_4, %c0_5] : memref<32x32xbf16, #tpu.memory_space<vmem>>, vector<32x32xbf16>
    %cst = arith.constant dense<0.000000e+00> : vector<32x128xf32>
    %8 = tpu.matmul %7, %6, %cst {dimension_numbers = #tpu.dot_dimension_numbers<[1], [0], [0], [1], [0, 0, 1, 1], [], []>} : vector<32x32xbf16>, vector<32x128xbf16>, vector<32x128xf32> -> vector<32x128xf32>
    %9 = vector.broadcast %1 : vector<32x1xf32> to vector<32x128xf32>
    %10 = arith.addf %8, %9 : vector<32x128xf32>
    %cst_6 = arith.constant 5.000000e-01 : f32
    %11 = vector.broadcast %cst_6 : f32 to vector<32x128xf32>
    %12 = arith.mulf %11, %10 : vector<32x128xf32>
    %cst_7 = arith.constant 5.000000e-01 : f32
    %13 = vector.broadcast %cst_7 : f32 to vector<32x128xf32>
    %14 = arith.mulf %13, %10 : vector<32x128xf32>
    %15 = math.tanh %14 : vector<32x128xf32>
    %cst_8 = arith.constant 1.000000e+00 : f32
    %16 = vector.broadcast %cst_8 : f32 to vector<32x128xf32>
    %17 = arith.addf %16, %15 : vector<32x128xf32>
    %18 = arith.mulf %12, %17 : vector<32x128xf32>
    %19 = vector.extract_strided_slice %18 {offsets = [0, 0], sizes = [16, 128], strides = [1, 1]} : vector<32x128xf32> to vector<16x128xf32>
    %20 = arith.truncf %19 : vector<16x128xf32> to vector<16x128xbf16>
    %21 = vector.extract_strided_slice %18 {offsets = [16, 0], sizes = [16, 128], strides = [1, 1]} : vector<32x128xf32> to vector<16x128xf32>
    %c0_9 = arith.constant 0 : index
    %c0_10 = arith.constant 0 : index
    %c0_11 = arith.constant 0 : index
    %22 = vector.load %arg3[%c0_9, %c0_10, %c0_11] : memref<1x16x1xf32, #tpu.memory_space<vmem>>, vector<1x16x1xf32>
    %23 = vector.shape_cast %22 : vector<1x16x1xf32> to vector<16x1xf32>
    %24 = vector.broadcast %23 : vector<16x1xf32> to vector<16x128xf32>
    %25 = arith.mulf %21, %24 : vector<16x128xf32>
    %c0_12 = arith.constant 0 : index
    %c0_13 = arith.constant 0 : index
    %26 = vector.load %arg5[%c0_12, %c0_13] : memref<32x16xbf16, #tpu.memory_space<vmem>>, vector<32x16xbf16>
    %27 = arith.truncf %25 : vector<16x128xf32> to vector<16x128xbf16>
    %cst_14 = arith.constant dense<0.000000e+00> : vector<32x128xf32>
    %28 = tpu.matmul %26, %27, %cst_14 {dimension_numbers = #tpu.dot_dimension_numbers<[1], [0], [0], [1], [0, 0, 1, 1], [], []>} : vector<32x16xbf16>, vector<16x128xbf16>, vector<32x128xf32> -> vector<32x128xf32>
    %29 = vector.broadcast %2 : vector<32x1xf32> to vector<32x128xf32>
    %30 = arith.addf %28, %29 : vector<32x128xf32>
    %cst_15 = arith.constant 5.000000e-01 : f32
    %31 = vector.broadcast %cst_15 : f32 to vector<32x128xf32>
    %32 = arith.mulf %31, %30 : vector<32x128xf32>
    %cst_16 = arith.constant 5.000000e-01 : f32
    %33 = vector.broadcast %cst_16 : f32 to vector<32x128xf32>
    %34 = arith.mulf %33, %30 : vector<32x128xf32>
    %35 = math.tanh %34 : vector<32x128xf32>
    %cst_17 = arith.constant 1.000000e+00 : f32
    %36 = vector.broadcast %cst_17 : f32 to vector<32x128xf32>
    %37 = arith.addf %36, %35 : vector<32x128xf32>
    %38 = arith.mulf %32, %37 : vector<32x128xf32>
    %c0_18 = arith.constant 0 : index
    %c0_19 = arith.constant 0 : index
    %39 = vector.load %arg6[%c0_18, %c0_19] : memref<16x32xbf16, #tpu.memory_space<vmem>>, vector<16x32xbf16>
    %40 = arith.truncf %38 : vector<32x128xf32> to vector<32x128xbf16>
    %cst_20 = arith.constant dense<0.000000e+00> : vector<16x128xf32>
    %41 = tpu.matmul %39, %40, %cst_20 {dimension_numbers = #tpu.dot_dimension_numbers<[1], [0], [0], [1], [0, 0, 1, 1], [], []>} : vector<16x32xbf16>, vector<32x128xbf16>, vector<16x128xf32> -> vector<16x128xf32>
    %42 = vector.broadcast %3 : vector<16x1xf32> to vector<16x128xf32>
    %43 = arith.addf %41, %42 : vector<16x128xf32>
    %44 = arith.addf %25, %43 : vector<16x128xf32>
    %45 = arith.truncf %44 : vector<16x128xf32> to vector<16x128xbf16>
    %c0_21 = arith.constant 0 : index
    %c0_22 = arith.constant 0 : index
    %46 = vector.load %arg7[%c0_21, %c0_22] : memref<32x16xbf16, #tpu.memory_space<vmem>>, vector<32x16xbf16>
    %cst_23 = arith.constant dense<0.000000e+00> : vector<32x128xf32>
    %47 = tpu.matmul %46, %20, %cst_23 {dimension_numbers = #tpu.dot_dimension_numbers<[1], [0], [0], [1], [0, 0, 1, 1], [], []>} : vector<32x16xbf16>, vector<16x128xbf16>, vector<32x128xf32> -> vector<32x128xf32>
    %c0_24 = arith.constant 0 : index
    %c0_25 = arith.constant 0 : index
    %48 = vector.load %arg8[%c0_24, %c0_25] : memref<32x16xbf16, #tpu.memory_space<vmem>>, vector<32x16xbf16>
    %cst_26 = arith.constant dense<0.000000e+00> : vector<32x128xf32>
    %49 = tpu.matmul %48, %45, %cst_26 {dimension_numbers = #tpu.dot_dimension_numbers<[1], [0], [0], [1], [0, 0, 1, 1], [], []>} : vector<32x16xbf16>, vector<16x128xbf16>, vector<32x128xf32> -> vector<32x128xf32>
    %50 = arith.addf %47, %49 : vector<32x128xf32>
    %51 = vector.broadcast %4 : vector<32x1xf32> to vector<32x128xf32>
    %52 = arith.addf %50, %51 : vector<32x128xf32>
    %cst_27 = arith.constant 5.000000e-01 : f32
    %53 = vector.broadcast %cst_27 : f32 to vector<32x128xf32>
    %54 = arith.mulf %53, %52 : vector<32x128xf32>
    %cst_28 = arith.constant 5.000000e-01 : f32
    %55 = vector.broadcast %cst_28 : f32 to vector<32x128xf32>
    %56 = arith.mulf %55, %52 : vector<32x128xf32>
    %57 = math.tanh %56 : vector<32x128xf32>
    %cst_29 = arith.constant 1.000000e+00 : f32
    %58 = vector.broadcast %cst_29 : f32 to vector<32x128xf32>
    %59 = arith.addf %58, %57 : vector<32x128xf32>
    %60 = arith.mulf %54, %59 : vector<32x128xf32>
    %c0_30 = arith.constant 0 : index
    %c0_31 = arith.constant 0 : index
    %c0_32 = arith.constant 0 : index
    %61 = vector.load %arg10[%c0_30, %c0_31, %c0_32] : memref<1x32x128xf32, #tpu.memory_space<vmem>>, vector<1x32x128xf32>
    %62 = vector.shape_cast %61 : vector<1x32x128xf32> to vector<32x128xf32>
    %63 = vector.shape_cast %60 : vector<32x128xf32> to vector<1x32x128xf32>
    tpu.vector_store %arg10[%c0_30, %c0_31, %c0_32], %63 {strides = array<i32>} : memref<1x32x128xf32, #tpu.memory_space<vmem>>, vector<1x32x128xf32>,
    return
  }
  func.func @transform_0(%arg0: i32, %arg1: i32) -> (i32, i32, i32) {
    %c0_i32 = arith.constant 0 : i32
    %c0_i32_0 = arith.constant 0 : i32
    return %arg0, %c0_i32, %arg1 : i32, i32, i32
  }
  func.func @transform_1(%arg0: i32, %arg1: i32) -> (i32, i32, i32) {
    %c0_i32 = arith.constant 0 : i32
    %c0_i32_0 = arith.constant 0 : i32
    %c0_i32_1 = arith.constant 0 : i32
    return %arg0, %c0_i32, %c0_i32_0 : i32, i32, i32
  }
  func.func @transform_2(%arg0: i32, %arg1: i32) -> (i32, i32) {
    %c0_i32 = arith.constant 0 : i32
    %c0_i32_0 = arith.constant 0 : i32
    %c0_i32_1 = arith.constant 0 : i32
    return %c0_i32, %c0_i32_0 : i32, i32
  }
  func.func @transform_3(%arg0: i32, %arg1: i32) -> (i32, i32) {
    %c0_i32 = arith.constant 0 : i32
    %c0_i32_0 = arith.constant 0 : i32
    %c0_i32_1 = arith.constant 0 : i32
    return %c0_i32, %c0_i32_0 : i32, i32
  }
  func.func @transform_4(%arg0: i32, %arg1: i32) -> (i32, i32) {
    %c0_i32 = arith.constant 0 : i32
    %c0_i32_0 = arith.constant 0 : i32
    %c0_i32_1 = arith.constant 0 : i32
    return %c0_i32, %c0_i32_0 : i32, i32
  }
  func.func @transform_5(%arg0: i32, %arg1: i32) -> (i32, i32) {
    %c0_i32 = arith.constant 0 : i32
    %c0_i32_0 = arith.constant 0 : i32
    %c0_i32_1 = arith.constant 0 : i32
    return %c0_i32, %c0_i32_0 : i32, i32
  }
  func.func @transform_6(%arg0: i32, %arg1: i32) -> (i32, i32) {
    %c0_i32 = arith.constant 0 : i32
    %c0_i32_0 = arith.constant 0 : i32
    %c0_i32_1 = arith.constant 0 : i32
    return %c0_i32, %c0_i32_0 : i32, i32
  }
  func.func @transform_7(%arg0: i32, %arg1: i32) -> (i32, i32) {
    %c0_i32 = arith.constant 0 : i32
    %c0_i32_0 = arith.constant 0 : i32
    %c0_i32_1 = arith.constant 0 : i32
    return %c0_i32, %c0_i32_0 : i32, i32
  }
  func.func @transform_8(%arg0: i32, %arg1: i32) -> (i32, i32, i32) {
    %c0_i32 = arith.constant 0 : i32
    %c0_i32_0 = arith.constant 0 : i32
    return %arg0, %c0_i32, %arg1 : i32, i32, i32
  }
}

</mosaic_0001>

<bundles_post_ra>
// kernel: psa_senetv2.2
= control target key start
LH: loop header
LB: loop body
LE: loop exit
PB: predicated region body
PF: predicated region fallthrough
CT: control target
= control target key end

     0   :  { %s1158_s0 = inlined_call_operand.hbm [shape: bf16[2,32,256], index: 0, kind: input, shape index: {}]   ;;  %s1159_s1 = inlined_call_operand.hbm [shape: bf16[16,32], index: 1, kind: input, shape index: {}]   ;;  %s1160_s2 = inlined_call_operand.hbm [shape: f32[16,1], index: 2, kind: input, shape index: {}]   ;;  %s1161_s3 = inlined_call_operand.hbm [shape: f32[2,2,16,1], index: 3, kind: output, shape index: {}]  }
   0x1   :  { %1170 = sst [smem:[#allocation13_spill]] %s1159_s1 }
   0x2   :  { %8 = vsyncpa [#allocation3], 0 }
   0x3   :  { %10 = vsyncpa [#allocation3 + $0x1], 0 }
   0x4   :  { %11 = vsyncpa [#allocation6], 0 }
   0x5   :  { %12 = vsyncpa [#allocation4], 0 }
   0x6   :  { %14 = vsyncpa [#allocation4 + $0x1], 0  ;;  %s855_s12 = smov 0   ;;  %s857_s13 = smov 0  }
   0x7   :  { %s859_s14 = smov 0   ;;  %s861_s15 = smov 0  }
   0x8   :  { %s863_s16 = smov 0   ;;  %s865_s17 = smov 0  }
   0x9   :  { %s867_s18 = smov 0   ;;  %s869_s19 = smov 0  }
   0xa LB: > { %s481_s20 = sadd.s32 4294967295, %s820_s19   ;;  %s482_s21 = sadd.s32 4294967294, %s820_s19   ;;  %s820_s19 = sphi %s869_s19, %s20_s19   ;;  %s816_s18 = sphi %s867_s18, %s1197_s18   ;;  %s812_s17 = sphi %s865_s17, %s1196_s17   ;;  %s808_s16 = sphi %s863_s16, %s1195_s16   ;;  %s804_s15 = sphi %s861_s15, %s1194_s15   ;;  %s800_s14 = sphi %s859_s14, %s1193_s14   ;;  %s796_s13 = sphi %s857_s13, %s1192_s13   ;;  %s792_s12 = sphi %s855_s12, %s1191_s12  }
   0xb   : > { %p57_p0 = scmp.ne.s32.totalorder %s800_s14, %s796_s13  ;;  %p58_p1 = scmp.eq.s32.totalorder %s820_s19, 0 }
   0xc   : > { %p63_p2 = scmp.ne.s32.totalorder %s796_s13, %s792_s12  ;;  %p902_p3 = scmp.eq.s32.totalorder %s481_s20, 0 }
   0xd   : > { %p131_p4 = scmp.eq.s32.totalorder %s481_s20, 3  ;;  %p906_p5 = por %p58_p1, %p57_p0 }
   0xe   : > { %s1171_s22 = scalar_select %p902_p3, 1, 0 }
   0xf   : > { %p137_p6 = scmp.eq.s32.totalorder %s482_s21, 3  ;;  %p912_p7 = por %p902_p3, %p63_p2 }
  0x10   : > { %p916_p8 = por %p131_p4, %p57_p0  ;;  %p483_p10 = scmp.ge.s32.totalorder %s820_s19, 1 }
  0x11   : > { %s1173_s24 = scalar_select %p912_p7, 1, 0 }
  0x12   : > { %s1174_s25 = scalar_select %p916_p8, 1, 0 }
  0x13   : > { %p920_p9 = por %p137_p6, %p63_p2  ;;  %p144_p11 = scmp.lt.s32.totalorder %s820_s19, 5 }
  0x14   : > { %s822_s28 = smov [#allocation5]   ;;  %p545_p0 = scmp.lt.s32.totalorder %s820_s19, 4 }
  0x15   : > { %s1175_s26 = scalar_select %p920_p9, 1, 0 }
  0x16   : > { %p926_p12 = pnand %p483_p10, %p144_p11  ;;  %s156_s29 = sshll.u32 %s822_s28, 4  ;;  %s930_s29 = int_to_ptr.vmem [resolvable:$true] %s156_s29 }
  0x17   : > { %1176 = sst [smem:[#allocation12_spill]] %s1175_s26  ;;  %s823_s4 = smov [#allocation7]  }
  0x18   : > { %p528_p13 = pneg %p926_p12  ;;  %s169_s5 = sshll.u32 %s823_s4, 4  ;;  %s947_s5 = int_to_ptr.vmem [resolvable:$true] %s169_s5 }
  0x19   : > { %p943_p2 = pnand %p545_p0, %p906_p5  ;;  %s1180_s1 = sld [smem:[#allocation13_spill]] }
  0x1a   : > { %p937_p1 = pnand %p528_p13, %p902_p3 }
  0x1c   : > { %p634_p6 = pneg %p937_p1 }
  0x1f   : > { %s632_s9 = scalar_lea.hbm %s1180_s1, 128 }
  0x20   : > { %p633_p4 = scmp.ne.s32.totalorder %s1180_s1, %s632_s9  ;;  %p639_p5 = scmp.lt.u32.totalorder %s632_s9, %s1180_s1 }
  0x22   : > { %p635_p10 = pnand %p634_p6, %p633_p4 }
  0x24   : > { %p636_p11 = pneg %p635_p10 }
  0x26   : > { %p641_p13 = pnand %p639_p5, %p636_p11 }
  0x28   : > { %644 = shalt.err (!%p641_p13)
}
  0x29   : > { %s645_s23 = scalar_lea.vmem %s930_s29, 128  ;;  %p653_p3 = scmp.lt.s32.totalorder %s930_s29, %s930_s29 }
  0x2a   : > { %p646_p0 = scmp.ne.s32.totalorder %s930_s29, %s645_s23  ;;  %p654_p4 = scmp.lt.s32.totalorder %s645_s23, %s645_s23 }
  0x2c   : > { %p648_p9 = pnand %p646_p0, %p634_p6  ;;  %p655_p10 = por %p654_p4, %p653_p3 }
  0x2e   : > { %p649_p8 = pneg %p648_p9 }
  0x30   : > { %p656_p7 = pnand %p655_p10, %p649_p8 }
  0x32   : > { %659 = shalt.err (!%p656_p7)
}
  0x33   : > { %s1167_s28 = smov 64   ;;  %s1169_s4 = smov 4  }
  0x34   : > { %531 = dma.hbm_to_vmem [thread:$0]  (!%p937_p1), %s1180_s1, 128, %s930_s29, [#allocation6], %s1167_s28, %s1167_s28, %s1169_s4  }
  0x35   : > { %s660_s11 = scalar_lea.hbm %s1160_s2, 256 }
  0x36   : > { %p661_p3 = scmp.ne.s32.totalorder %s1160_s2, %s660_s11  ;;  %p667_p9 = scmp.lt.u32.totalorder %s660_s11, %s1160_s2 }
  0x38   : > { %p663_p7 = pnand %p661_p3, %p634_p6 }
  0x3a   : > { %p664_p8 = pneg %p663_p7 }
  0x3c   : > { %p669_p11 = pnand %p667_p9, %p664_p8 }
  0x3e   : > { %672 = shalt.err (!%p669_p11)
}
  0x3f   : > { %s673_s29 = scalar_lea.vmem %s947_s5, 256  ;;  %p681_p4 = scmp.lt.s32.totalorder %s947_s5, %s947_s5 }
  0x40   : > { %p674_p5 = scmp.ne.s32.totalorder %s947_s5, %s673_s29  ;;  %p682_p10 = scmp.lt.s32.totalorder %s673_s29, %s673_s29 }
  0x42   : > { %p676_p13 = pnand %p674_p5, %p634_p6  ;;  %p683_p3 = por %p682_p10, %p681_p4 }
  0x44   : > { %p677_p0 = pneg %p676_p13 }
  0x46   : > { %p684_p7 = pnand %p683_p3, %p677_p0 }
  0x48   : > { %687 = shalt.err (!%p684_p7)
}
  0x49   : > { %s1168_s26 = smov 128   ;;  %s827_s7 = smov 8  }
  0x4a   : > { %534 = dma.hbm_to_vmem [thread:$0]  (!%p937_p1), %s1160_s2, 256, %s947_s5, [#allocation6], %s1168_s26, %s1168_s26, %s827_s7  }
  0x4b   : > { %s35_s10 = sadd.s32 1, %s812_s17  ;;  %s39_s11 = sadd.s32 1, %s816_s18 }
  0x4c   : > { %p37_p6 = scmp.ge.s32.totalorder %s35_s10, 2  ;;  %s183_s20 = sand.u32 1, %s800_s14  }
  0x4d   : > { %s487_s21 = sshll.u32 %s183_s20, 4  ;;  %s488_s30 = sshll.u32 %s816_s18, 3 }
  0x4e   : > { %s1199_s10 = smov (%p37_p6, %s35_s10), 0  ;;  %s1201_s11 = smov (!%p37_p6, %s39_s11), %s816_s18 }
  0x4f   : > { %s46_s23 = ssub.s32 %s812_s17, %s1199_s10  ;;  %p41_p8 = scmp.ge.s32.totalorder %s1201_s11, 2 }
  0x50   : > { %s193_s29 = sadd.s32 %s812_s17, %s488_s30  ;;  %s187_s28 = scalar_lea.vmem [#allocation2], %s487_s21 }
  0x51   : > { %s196_s8 = sshll.u32 %s187_s28, 4  ;;  %s1203_s11 = smov (%p41_p8, %s1201_s11), 0  ;;  %s1018_s8 = int_to_ptr.vmem [resolvable:$true] %s196_s8 }
  0x52   : > { %s489_s5 = sshll.u32 %s193_s29, 6  ;;  %s45_s7 = ssub.s32 %s816_s18, %s1203_s11 }
  0x53   : > { %s1025_s4 = scalar_lea.hbm %s1158_s0, %s489_s5  ;;  %s1028_s30 = sor.u32 %s46_s23, %s45_s7 }
  0x54   : > { %s1031_s28 = scalar_lea.sflag [#allocation3], %s183_s20  ;;  %s688_s21 = scalar_lea.hbm %s1025_s4, 256 }
  0x55   : > { %p689_p9 = scmp.ne.s32.totalorder %s1025_s4, %s688_s21  ;;  %p690_p11 = pneg %p943_p2 }
  0x56   : > { %s693_s5 = scalar_lea.hbm %s1158_s0, 1024  ;;  %p694_p0 = scmp.lt.u32.totalorder %s1025_s4, %s1158_s0 }
  0x57   : > { %p691_p5 = pnand %p690_p11, %p689_p9  ;;  %p695_p4 = scmp.lt.u32.totalorder %s693_s5, %s688_s21 }
  0x58   : > { %p697_p3 = scmp.lt.u32.totalorder %s688_s21, %s1025_s4 }
  0x59   : > { %p692_p13 = pneg %p691_p5  ;;  %p696_p10 = por %p695_p4, %p694_p0 }
  0x5b   : > { %p698_p7 = por %p697_p3, %p696_p10 }
  0x5d   : > { %p699_p6 = pnand %p698_p7, %p692_p13 }
  0x5f   : > { %702 = shalt.err (!%p699_p6)
}
  0x60   : > { %s703_s20 = scalar_lea.vmem %s1018_s8, 256  ;;  %s828_s23 = smov [#allocation2]  }
  0x61   : > { %p704_p8 = scmp.ne.s32.totalorder %s1018_s8, %s703_s20  ;;  %s708_s7 = sshll.u32 %s828_s23, 4  ;;  %s709_s7 = int_to_ptr.vmem [resolvable:$false] %s708_s7 }
  0x62   : > { %s710_s1 = scalar_lea.vmem %s709_s7, 512  ;;  %p711_p1 = scmp.lt.s32.totalorder %s1018_s8, %s709_s7 }
  0x63   : > { %p706_p9 = pnand %p704_p8, %p690_p11  ;;  %p712_p0 = scmp.lt.s32.totalorder %s710_s1, %s703_s20 }
  0x65   : > { %p707_p5 = pneg %p706_p9  ;;  %p713_p4 = por %p712_p0, %p711_p1 }
  0x67   : > { %p714_p10 = pnand %p713_p4, %p707_p5 }
  0x69   : > { %717 = shalt.err (!%p714_p10)
}
  0x6a   : > { %s1181_s21 = smov 4   ;;  %s1182_s26 = smov 64  }
  0x6b   : > { %s1183_s29 = smov 128   ;;  %s1184_s5 = sadd.s32 1, %s800_s14 }
  0x6c   : > { %538 = dma.hbm_to_vmem [thread:$0]  (!%p943_p2), %s1025_s4, 256, %s1018_s8, %s1031_s28, %s1183_s29, %s1182_s26, %s1181_s21  }
  0x6d   : > { %p1185_p11 = scmp.eq.s32.totalorder %s1028_s30, 0  ;;  %208 = sbr.rel (%p926_p12) target bundleno = 523 (0x20b), region = 32 }
  0x6e   : > { %s1072_s6 = sand.u32 (!%p926_p12), 1, %s796_s13   ;;  %p1186_p1 = scmp.ne.s32.totalorder (!%p926_p12), %s1173_s24, 0 }
  0x6f   : > { %s1067_s9 = scalar_select %p1185_p11, %s800_s14, %s1184_s5  }
  0x70   : > { %s491_s20 = sshll.u32 (!%p926_p12), %s1072_s6, 4  ;;  %s211_s23 = scalar_lea.sflag (!%p926_p12), [#allocation3], %s1072_s6 }
  0x71   : > { %s214_s7 = scalar_lea.vmem (!%p926_p12), [#allocation2], %s491_s20 }
  0x74   : > { %779 = dma.done.wait (%p1186_p1), %s211_s23, 256  }
  0x75   : > { %781 = vsyncadd (%p1186_p1), %s211_s23, 4294967040  ;;  %p1187_p2 = scmp.ne.s32.totalorder %s1171_s22, 0 }
  0x77   : > { %783 = dma.done.wait (%p1187_p2), [#allocation6], 384  }
  0x78   : > { %785 = vsyncadd (%p1187_p2), [#allocation6], 4294966912  ;;  %vm251_vm0 = vcmask 7168   ;;  %s1084_s27 = scalar_lea.vmem [#allocation8], %s491_s20  ;;  %v829_v0 = vmov 0.0   ;;  %vm830_vm1 = vmmov 0  }
  0x79   : > { %252 = vst.msk [vmem:[%s1084_s27] sm:$0xff] %vm251_vm0, %v829_v0  ;;  %253 = vst.msk [vmem:[%s1084_s27 + $0x8] sm:$0xff] %vm251_vm0, %v829_v0  ;;  %508 = vmatprep.subr.bf16.mxu0 %v829_v0  ;;  %512 = vmatprep.mubr.msk.bf16.mxu0 %vm830_vm1, %v829_v0  ;;  %v831_v1 = vmov 0   ;;  %v625_v2 = vld [vmem:[%s214_s7] sm:$0xff]   ;;  %v626_v3 = vld [vmem:[%s214_s7 + $0x8] sm:$0xff]   ;;  %vm289_vm2 = vcmask 261120  }
  0x7a   : > { %624 = vset.pattern.permute.xlu0 %v831_v1  ;;  %509 = vmatpush3.bf16.msra.mxu0 %v625_v2  ;;  %v260_v4 = vld [vmem:[#allocation7] sm:$0xff]  ;;  %v627_v5 = vld [vmem:[#allocation5] sm:$0xff]   ;;  %v261_v6 = vld [vmem:[#allocation7 + $0x8] sm:$0xff]  ;;  %s500_s22 = sshll.u32 %s804_s15, 1  ;;  %s501_s24 = sshll.u32 %s808_s16, 2 }
  0x7b   : > { %510 = vmatprep.subr.bf16.mxu0 %v829_v0  ;;  %264 = vperm.xlu0 %624, %v260_v4   ;;  %s366_s4 = sadd.s32 %s501_s24, %s500_s22  ;;  %s369_s30 = sshll.u32 %s1084_s27, 4  ;;  %s1102_s30 = int_to_ptr.vmem [resolvable:$true] %s369_s30 }
  0x7c   : > { %s502_s8 = sshll.u32 %s366_s4, 7  ;;  %s354_s15 = scalar_lea.sflag [#allocation4], %s1072_s6 }
  0x7d   : > { %s1100_s21 = scalar_lea.hbm %s1161_s3, %s502_s8  ;;  %s718_s16 = scalar_lea.vmem %s1102_s30, 256 }
  0x7e   : > { %511 = vmatpush3.bf16.msra.mxu0 %v626_v3  ;;  %p719_p12 = scmp.ne.s32.totalorder %s1102_s30, %s718_s16  ;;  %p1188_p13 = scmp.ne.s32.totalorder %s1174_s25, 0 }
  0x7f   : > { %269 = vperm.xlu0 %624, %v261_v6   ;;  %s832_s26 = smov [#allocation8]  }
  0x80   : > { %v342_v23 = vld [vmem:[%s1084_s27] sm:$0xff]  ;;  %v343_v26 = vld [vmem:[%s1084_s27 + $0x8] sm:$0xff]  ;;  %p720_p3 = pnand %p719_p12, %p1188_p13  ;;  %s722_s29 = sshll.u32 %s832_s26, 4  ;;  %s723_s29 = int_to_ptr.vmem [resolvable:$false] %s722_s29 }
  0x81   : > { %513 = vmatmul.mubr.msk.bf16.vlgmr.msra.gmra.mrb[0].mxu0 %vm289_vm2, %v627_v5  ;;  %s724_s5 = scalar_lea.vmem %s723_s29, 512  ;;  %p725_p6 = scmp.lt.s32.totalorder %s1102_s30, %s723_s29 }
  0x82   : > { %p721_p7 = pneg %p720_p3  ;;  %p726_p8 = scmp.lt.s32.totalorder %s724_s5, %s718_s16 }
  0x84   : > { %p727_p9 = por %p726_p8, %p725_p6 }
  0x86   : > { %p728_p5 = pnand %p727_p9, %p721_p7 }
  0xfa   : > { %v265_v7 = vpop.permute.xlu0 %264 }
  0xfe   : > { %v270_v11 = vpop.permute.xlu0 %269 }
 0x154   : > { %v327_v8 = vpop.f32.mrb[0].mxu0 }
 0x155   : > { %v328_v9 = vadd.f32 %v327_v8, %v265_v7  ;;  %v514_v10 = vpop.f32.mrb[1].mxu0 }
 0x156   : > { %v330_v12 = vpop.f32.mrb[2].mxu0 }
 0x157   : > { %v334_v13 = vmul.f32 0.5, %v328_v9  ;;  %v331_v14 = vadd.f32 %v330_v12, %v270_v11  ;;  %v515_v15 = vpop.f32.mrb[3].mxu0 }
 0x159   : > { %628 = vtanh.f32 %v334_v13  ;;  %v335_v16 = vmul.f32 0.5, %v331_v14 }
 0x15b   : > { %630 = vtanh.f32 %v335_v16 }
 0x163   : > { %v629_v17 = vpop.eup %628 }
 0x164   : > { %v338_v18 = vadd.f32 1.0, %v629_v17 }
 0x165   : > { %v631_v19 = vpop.eup %630 }
 0x166   : > { %v340_v20 = vmul.f32 %v338_v18, %v334_v13  ;;  %v339_v21 = vadd.f32 1.0, %v631_v19 }
 0x168   : > { %344 = vadd.xlane.f32.xlu1 %v340_v20  ;;  %v341_v22 = vmul.f32 %v339_v21, %v335_v16 }
 0x16c   : > { %346 = vadd.xlane.f32.xlu1 %v341_v22 }
 0x1f5   : > { %v345_v24 = vpop.xlane.xlu1 %344 }
 0x1f6   : > { %v348_v25 = vadd.f32 %v345_v24, %v342_v23 }
 0x1f8   : > { %351 = vst.msk [vmem:[%s1084_s27] sm:$0xff] %vm251_vm0, %v348_v25 }
 0x1f9   : > { %v347_v27 = vpop.xlane.xlu1 %346 }
 0x1fa   : > { %v349_v28 = vadd.f32 %v347_v27, %v343_v26 }
 0x1fc   : > { %352 = vst.msk [vmem:[%s1084_s27 + $0x8] sm:$0xff] %vm251_vm0, %v349_v28 }
 0x1fd   : > { %731 = shalt.err (!%p728_p5)
}
 0x1fe   : > { %s732_s20 = scalar_lea.hbm %s1100_s21, 256  ;;  %s736_s27 = scalar_lea.hbm %s1161_s3, 1024 }
 0x1ff   : > { %p733_p0 = scmp.ne.s32.totalorder %s1100_s21, %s732_s20  ;;  %p737_p11 = scmp.lt.u32.totalorder %s1100_s21, %s1161_s3 }
 0x200   : > { %p738_p1 = scmp.lt.u32.totalorder %s736_s27, %s732_s20  ;;  %p740_p12 = scmp.lt.u32.totalorder %s732_s20, %s1100_s21 }
 0x201   : > { %p734_p4 = pnand %p733_p0, %p1188_p13 }
 0x202   : > { %p739_p2 = por %p738_p1, %p737_p11 }
 0x203   : > { %p735_p10 = pneg %p734_p4 }
 0x204   : > { %p741_p3 = por %p740_p12, %p739_p2 }
 0x206   : > { %p742_p7 = pnand %p741_p3, %p735_p10 }
 0x208   : > { %745 = shalt.err (!%p742_p7)
}
 0x209   : > { %s833_s4 = smov 128   ;;  %s834_s8 = smov 8  }
 0x20a   : > { %526 = dma.vmem_to_hbm [thread:$0]  (%p1188_p13), %s1102_s30, 256, %s1100_s21, %s354_s15, %s833_s4, %s833_s4, %s834_s8  }
 0x20b PF: > { %s1189_s28 = sld [smem:[#allocation12_spill]]  ;;  %p548_p6 = scmp.ge.s32.totalorder %s820_s19, 2 }
 0x20c   : > { %s384_s1 = sand.u32 1, %s792_s12  }
 0x20d   : > { %s385_s16 = scalar_lea.sflag [#allocation4], %s384_s1 }
 0x211   : > { %p1190_p8 = scmp.ne.s32.totalorder %s1189_s28, 0 }
 0x213   : > { %p540_p9 = pnand %p548_p6, %p1190_p8 }
 0x215   : > { %787 = dma.done.wait (!%p540_p9), %s385_s16, 256  }
 0x216   : > { %789 = vsyncadd (!%p540_p9), %s385_s16, 4294967040  ;;  %s20_s19 = sadd.s32 1, %s820_s19   ;;  %s1191_s12 = smov %s796_s13 }
 0x217   : > { %p17_p5 = scmp.ge.s32.totalorder %s20_s19, 6   ;;  %s1192_s13 = smov %s800_s14 }
 0x218   : > { %s1193_s14 = smov %s1067_s9  ;;  %s1194_s15 = smov %s812_s17 }
 0x219   : > { %s1195_s16 = smov %s816_s18  ;;  %s1196_s17 = smov %s1199_s10 }
 0x21a   : > { %s1197_s18 = smov %s1203_s11  ;;  %19 = sbr.rel (!%p17_p5) target bundleno = 10 (0xa), region = 89 }
 0x221   :  { %390 = vsyncpa [#allocation3], 1 }
 0x222   :  { %392 = vsyncpa [#allocation3 + $0x1], 1 }
 0x223   :  { %393 = vsyncpa [#allocation6], 1 }
 0x224   :  { %394 = vsyncpa [#allocation4], 1 }
 0x225   :  { %396 = vsyncpa [#allocation4 + $0x1], 1 }

// kernel: psa_senetv2.3
= control target key start
LH: loop header
LB: loop body
LE: loop exit
PB: predicated region body
PF: predicated region fallthrough
CT: control target
= control target key end

     0   :  { %s2422_s0 = inlined_call_operand.hbm [shape: bf16[2,32,256], index: 0, kind: input, shape index: {}]   ;;  %s2423_s1 = inlined_call_operand.hbm [shape: f32[2,16,1], index: 1, kind: input, shape index: {}]   ;;  %s2424_s2 = inlined_call_operand.hbm [shape: bf16[32,32], index: 2, kind: input, shape index: {}]   ;;  %s2425_s3 = inlined_call_operand.hbm [shape: bf16[32,16], index: 3, kind: input, shape index: {}]   ;;  %s2426_s4 = inlined_call_operand.hbm [shape: bf16[16,32], index: 4, kind: input, shape index: {}]   ;;  %s2427_s5 = inlined_call_operand.hbm [shape: bf16[32,16], index: 5, kind: input, shape index: {}]   ;;  %s2428_s6 = inlined_call_operand.hbm [shape: bf16[32,16], index: 6, kind: input, shape index: {}]   ;;  %s2429_s7 = inlined_call_operand.hbm [shape: f32[112,1], index: 7, kind: input, shape index: {}]   ;;  %s2430_s8 = inlined_call_operand.hbm [shape: f32[2,32,256], index: 8, kind: output, shape index: {}]  }
   0x1   :  { %2447 = sst [smem:[#allocation30_spill]] %s2422_s0 }
   0x2   :  { %2448 = sst [smem:[#allocation31_spill]] %s2423_s1 }
   0x3   :  { %2449 = sst [smem:[#allocation32_spill]] %s2424_s2 }
   0x4   :  { %2450 = sst [smem:[#allocation33_spill]] %s2425_s3 }
   0x5   :  { %2451 = sst [smem:[#allocation34_spill]] %s2426_s4 }
   0x6   :  { %2452 = sst [smem:[#allocation35_spill]] %s2427_s5 }
   0x7   :  { %2453 = sst [smem:[#allocation36_spill]] %s2428_s6 }
   0x8   :  { %2454 = sst [smem:[#allocation37_spill]] %s2429_s7 }
   0x9   :  { %2455 = sst [smem:[#allocation38_spill]] %s2430_s8 }
   0xa   :  { %13 = vsyncpa [#allocation3], 0 }
   0xb   :  { %15 = vsyncpa [#allocation3 + $0x1], 0 }
   0xc   :  { %16 = vsyncpa [#allocation6], 0 }
   0xd   :  { %18 = vsyncpa [#allocation6 + $0x1], 0 }
   0xe   :  { %19 = vsyncpa [#allocation9], 0 }
   0xf   :  { %20 = vsyncpa [#allocation12], 0 }
  0x10   :  { %21 = vsyncpa [#allocation15], 0 }
  0x11   :  { %22 = vsyncpa [#allocation4], 0 }
  0x12   :  { %24 = vsyncpa [#allocation4 + $0x1], 0  ;;  %s1915_s27 = smov 0   ;;  %s1917_s28 = smov 0  }
  0x13   :  { %s1919_s29 = smov 0   ;;  %s1921_s30 = smov 0  }
  0x14   :  { %s1923_s9 = smov 0   ;;  %s1925_s10 = smov 0  }
  0x15   :  { %s1927_s11 = smov 0   ;;  %s1929_s12 = smov 0  }
  0x16   :  { %s1931_s13 = smov 0   ;;  %s1933_s14 = smov 0  }
  0x17   :  { %s1935_s15 = smov 0  }
  0x18 LB: > { %2456 = sst [smem:[#allocation24_spill]] %s1809_s27  ;;  %s1971_s16 = sadd.s32 4294967295, %s1849_s15   ;;  %s1849_s15 = sphi %s1935_s15, %s30_s15   ;;  %s1845_s14 = sphi %s1933_s14, %s2521_s14   ;;  %s1841_s13 = sphi %s1931_s13, %s2520_s13   ;;  %s1837_s12 = sphi %s1929_s12, %s2519_s12   ;;  %s1833_s11 = sphi %s1927_s11, %s2518_s11   ;;  %s1829_s10 = sphi %s1925_s10, %s2517_s10   ;;  %s1825_s9 = sphi %s1923_s9, %s2516_s9   ;;  %s1821_s30 = sphi %s1921_s30, %s2515_s30   ;;  %s1817_s29 = sphi %s1919_s29, %s2514_s29   ;;  %s1813_s28 = sphi %s1917_s28, %s2513_s28   ;;  %s1809_s27 = sphi %s1915_s27, %s2512_s27  }
  0x19   : > { %2457 = sst [smem:[#allocation25_spill]] %s1813_s28  ;;  %p1160_p0 = scmp.ge.s32.totalorder %s1849_s15, 1 }
  0x1a   : > { %2458 = sst [smem:[#allocation26_spill]] %s1833_s11  ;;  %p2435_p1 = scmp.eq.s32.totalorder %s1971_s16, 0 }
  0x1b   : > { %2459 = sst [smem:[#allocation27_spill]] %s1837_s12  ;;  %p255_p2 = scmp.lt.s32.totalorder %s1849_s15, 5 }
  0x1c   : > { %s1851_s18 = smov [#allocation7]   ;;  %s1852_s21 = smov [#allocation8]  }
  0x1d   : > { %p1976_p3 = pnand %p1160_p0, %p255_p2  ;;  %s267_s19 = sshll.u32 %s1851_s18, 4  ;;  %s1980_s19 = int_to_ptr.vmem [resolvable:$true] %s267_s19 }
  0x1e   : > { %s280_s22 = sshll.u32 %s1852_s21, 4  ;;  %s1853_s23 = smov [#allocation11]   ;;  %s1990_s22 = int_to_ptr.vmem [resolvable:$true] %s280_s22 }
  0x1f   : > { %s2460_s17 = scalar_select %p1976_p3, 1, 0 }
  0x20   : > { %p1294_p4 = pneg %p1976_p3  ;;  %s1992_s24 = sshll.u32 %s1853_s23, 4  ;;  %s307_s24 = int_to_ptr.vmem [resolvable:$true] %s1992_s24 }
  0x21   : > { %2461 = sst [smem:[#allocation28_spill]] %s2460_s17  ;;  %s2463_s2 = sld [smem:[#allocation32_spill]] }
  0x22   : > { %p1986_p5 = pnand %p1294_p4, %p2435_p1 }
  0x24   : > { %p2002_p7 = pneg %p1986_p5 }
  0x27   : > { %s1479_s18 = scalar_lea.hbm %s2463_s2, 256 }
  0x28   : > { %p1480_p6 = scmp.ne.s32.totalorder %s2463_s2, %s1479_s18  ;;  %p1486_p10 = scmp.lt.u32.totalorder %s1479_s18, %s2463_s2 }
  0x2a   : > { %p1482_p8 = pnand %p2002_p7, %p1480_p6 }
  0x2c   : > { %p1483_p9 = pneg %p1482_p8 }
  0x2e   : > { %p1488_p11 = pnand %p1486_p10, %p1483_p9 }
  0x30   : > { %1491 = shalt.err (!%p1488_p11)
}
  0x31   : > { %s1492_s8 = scalar_lea.vmem %s1980_s19, 256  ;;  %p1500_p2 = scmp.lt.s32.totalorder %s1980_s19, %s1980_s19 }
  0x32   : > { %p1493_p12 = scmp.ne.s32.totalorder %s1980_s19, %s1492_s8  ;;  %p1501_p4 = scmp.lt.s32.totalorder %s1492_s8, %s1492_s8 }
  0x34   : > { %p1495_p13 = pnand %p1493_p12, %p2002_p7  ;;  %p1502_p6 = por %p1501_p4, %p1500_p2 }
  0x36   : > { %p1496_p0 = pneg %p1495_p13 }
  0x38   : > { %p1503_p8 = pnand %p1502_p6, %p1496_p0 }
  0x3a   : > { %1506 = shalt.err (!%p1503_p8)
}
  0x3b   : > { %s2440_s11 = smov 64   ;;  %s2441_s25 = smov 4  }
  0x3c   : > { %1297 = dma.hbm_to_vmem [thread:$0]  (!%p1986_p5), %s2463_s2, 256, %s1980_s19, [#allocation6], %s2440_s11, %s2440_s11, %s2441_s25  }
  0x3d   : > { %s2465_s3 = sld [smem:[#allocation33_spill]] }
  0x43   : > { %s1507_s8 = scalar_lea.hbm %s2465_s3, 256 }
  0x44   : > { %p1508_p9 = scmp.ne.s32.totalorder %s2465_s3, %s1507_s8  ;;  %p1514_p12 = scmp.lt.u32.totalorder %s1507_s8, %s2465_s3 }
  0x46   : > { %p1510_p10 = pnand %p1508_p9, %p2002_p7 }
  0x48   : > { %p1511_p11 = pneg %p1510_p10 }
  0x4a   : > { %p1516_p13 = pnand %p1514_p12, %p1511_p11 }
  0x4c   : > { %1519 = shalt.err (!%p1516_p13)
}
  0x4d   : > { %s1520_s19 = scalar_lea.vmem %s1990_s22, 256  ;;  %p1528_p6 = scmp.lt.s32.totalorder %s1990_s22, %s1990_s22 }
  0x4e   : > { %p1521_p0 = scmp.ne.s32.totalorder %s1990_s22, %s1520_s19  ;;  %p1529_p8 = scmp.lt.s32.totalorder %s1520_s19, %s1520_s19 }
  0x50   : > { %p1523_p2 = pnand %p1521_p0, %p2002_p7  ;;  %p1530_p9 = por %p1529_p8, %p1528_p6 }
  0x52   : > { %p1524_p4 = pneg %p1523_p2 }
  0x54   : > { %p1531_p10 = pnand %p1530_p9, %p1524_p4 }
  0x56   : > { %1534 = shalt.err (!%p1531_p10)
}
  0x57   : > { %1300 = dma.hbm_to_vmem [thread:$0]  (!%p1986_p5), %s2465_s3, 256, %s1990_s22, [#allocation9], %s2440_s11, %s2440_s11, %s2441_s25  }
  0x58   : > { %s2466_s5 = sld [smem:[#allocation35_spill]] }
  0x5e   : > { %s1535_s26 = scalar_lea.hbm %s2466_s5, 256 }
  0x5f   : > { %p1536_p11 = scmp.ne.s32.totalorder %s2466_s5, %s1535_s26  ;;  %p1542_p0 = scmp.lt.u32.totalorder %s1535_s26, %s2466_s5 }
  0x61   : > { %p1538_p12 = pnand %p1536_p11, %p2002_p7 }
  0x63   : > { %p1539_p13 = pneg %p1538_p12 }
  0x65   : > { %p1544_p2 = pnand %p1542_p0, %p1539_p13 }
  0x67   : > { %1547 = shalt.err (!%p1544_p2)
}
  0x68   : > { %s1548_s19 = scalar_lea.vmem %s307_s24, 256  ;;  %p1556_p9 = scmp.lt.s32.totalorder %s307_s24, %s307_s24 }
  0x69   : > { %p1549_p4 = scmp.ne.s32.totalorder %s307_s24, %s1548_s19  ;;  %p1557_p10 = scmp.lt.s32.totalorder %s1548_s19, %s1548_s19 }
  0x6b   : > { %p1551_p6 = pnand %p1549_p4, %p2002_p7  ;;  %p1558_p1 = por %p1557_p10, %p1556_p9 }
  0x6d   : > { %p1552_p8 = pneg %p1551_p6 }
  0x6f   : > { %p1559_p3 = pnand %p1558_p1, %p1552_p8 }
  0x71   : > { %1562 = shalt.err (!%p1559_p3)
}
  0x72   : > { %1306 = dma.hbm_to_vmem [thread:$0]  (!%p1986_p5), %s2466_s5, 256, %s307_s24, [#allocation12], %s2440_s11, %s2440_s11, %s2441_s25  }
  0x73   : > { %s1856_s27 = smov [#allocation10]   ;;  %s1857_s17 = smov [#allocation13]  }
  0x74   : > { %s293_s28 = sshll.u32 %s1856_s27, 4  ;;  %s319_s26 = sshll.u32 %s1857_s17, 4  ;;  %s294_s28 = int_to_ptr.vmem [resolvable:$true] %s293_s28  ;;  %s320_s26 = int_to_ptr.vmem [resolvable:$true] %s319_s26 }
  0x75   : > { %s2467_s4 = sld [smem:[#allocation34_spill]] }
  0x7b   : > { %s1563_s23 = scalar_lea.hbm %s2467_s4, 128 }
  0x7c   : > { %p1564_p1 = scmp.ne.s32.totalorder %s2467_s4, %s1563_s23  ;;  %p1570_p12 = scmp.lt.u32.totalorder %s1563_s23, %s2467_s4 }
  0x7e   : > { %p1566_p3 = pnand %p1564_p1, %p2002_p7 }
  0x80   : > { %p1567_p11 = pneg %p1566_p3 }
  0x82   : > { %p1572_p13 = pnand %p1570_p12, %p1567_p11 }
  0x84   : > { %1575 = shalt.err (!%p1572_p13)
}
  0x85   : > { %s1576_s24 = scalar_lea.vmem %s294_s28, 128  ;;  %p1584_p6 = scmp.lt.s32.totalorder %s294_s28, %s294_s28 }
  0x86   : > { %p1577_p0 = scmp.ne.s32.totalorder %s294_s28, %s1576_s24  ;;  %p1585_p8 = scmp.lt.s32.totalorder %s1576_s24, %s1576_s24 }
  0x88   : > { %p1579_p2 = pnand %p1577_p0, %p2002_p7  ;;  %p1586_p9 = por %p1585_p8, %p1584_p6 }
  0x8a   : > { %p1580_p4 = pneg %p1579_p2 }
  0x8c   : > { %p1587_p10 = pnand %p1586_p9, %p1580_p4 }
  0x8e   : > { %1590 = shalt.err (!%p1587_p10)
}
  0x8f   : > { %1303 = dma.hbm_to_vmem [thread:$0]  (!%p1986_p5), %s2467_s4, 128, %s294_s28, [#allocation9], %s2440_s11, %s2440_s11, %s2441_s25  }
  0x90   : > { %s2468_s6 = sld [smem:[#allocation36_spill]] }
  0x96   : > { %s1591_s18 = scalar_lea.hbm %s2468_s6, 256 }
  0x97   : > { %p1592_p1 = scmp.ne.s32.totalorder %s2468_s6, %s1591_s18  ;;  %p1598_p12 = scmp.lt.u32.totalorder %s1591_s18, %s2468_s6 }
  0x99   : > { %p1594_p3 = pnand %p1592_p1, %p2002_p7 }
  0x9b   : > { %p1595_p11 = pneg %p1594_p3 }
  0x9d   : > { %p1600_p13 = pnand %p1598_p12, %p1595_p11 }
  0x9f   : > { %1603 = shalt.err (!%p1600_p13)
}
  0xa0   : > { %s1604_s22 = scalar_lea.vmem %s320_s26, 256  ;;  %p1612_p6 = scmp.lt.s32.totalorder %s320_s26, %s320_s26 }
  0xa1   : > { %p1605_p0 = scmp.ne.s32.totalorder %s320_s26, %s1604_s22  ;;  %p1613_p8 = scmp.lt.s32.totalorder %s1604_s22, %s1604_s22 }
  0xa3   : > { %p1607_p2 = pnand %p1605_p0, %p2002_p7  ;;  %p1614_p9 = por %p1613_p8, %p1612_p6 }
  0xa5   : > { %p1608_p4 = pneg %p1607_p2 }
  0xa7   : > { %p1615_p10 = pnand %p1614_p9, %p1608_p4 }
  0xa9   : > { %1618 = shalt.err (!%p1615_p10)
}
  0xaa   : > { %1309 = dma.hbm_to_vmem [thread:$0]  (!%p1986_p5), %s2468_s6, 256, %s320_s26, [#allocation12], %s2440_s11, %s2440_s11, %s2441_s25  }
  0xab   : > { %s1858_s2 = smov [#allocation14]   ;;  %s2469_s7 = sld [smem:[#allocation37_spill]] }
  0xac   : > { %s332_s1 = sshll.u32 %s1858_s2, 4  ;;  %s333_s1 = int_to_ptr.vmem [resolvable:$true] %s332_s1 }
  0xb1   : > { %s1619_s18 = scalar_lea.hbm %s2469_s7, 1792 }
  0xb2   : > { %p1620_p1 = scmp.ne.s32.totalorder %s2469_s7, %s1619_s18  ;;  %p1626_p12 = scmp.lt.u32.totalorder %s1619_s18, %s2469_s7 }
  0xb4   : > { %p1622_p3 = pnand %p1620_p1, %p2002_p7 }
  0xb6   : > { %p1623_p11 = pneg %p1622_p3 }
  0xb8   : > { %p1628_p13 = pnand %p1626_p12, %p1623_p11 }
  0xba   : > { %1631 = shalt.err (!%p1628_p13)
}
  0xbb   : > { %s1632_s26 = scalar_lea.vmem %s333_s1, 1792  ;;  %p1640_p6 = scmp.lt.s32.totalorder %s333_s1, %s333_s1 }
  0xbc   : > { %p1633_p0 = scmp.ne.s32.totalorder %s333_s1, %s1632_s26  ;;  %p1641_p8 = scmp.lt.s32.totalorder %s1632_s26, %s1632_s26 }
  0xbe   : > { %p1635_p2 = pnand %p1633_p0, %p2002_p7  ;;  %p1642_p9 = por %p1641_p8, %p1640_p6 }
  0xc0   : > { %p1636_p4 = pneg %p1635_p2 }
  0xc2   : > { %p1643_p10 = pnand %p1642_p9, %p1636_p4 }
  0xc4   : > { %1646 = shalt.err (!%p1643_p10)
}
  0xc5   : > { %s2438_s22 = smov 128   ;;  %s2437_s12 = smov 8  }
  0xc6   : > { %1312 = dma.hbm_to_vmem [thread:$0]  (!%p1986_p5), %s2469_s7, 1792, %s333_s1, [#allocation15], %s2438_s22, %s2438_s22, %s2437_s12  }
  0xc7   : > { %s1159_s2 = sadd.s32 4294967294, %s1849_s15   ;;  %s39_s27 = sadd.s32 1, %s1841_s13 }
  0xc8   : > { %p40_p7 = scmp.ge.s32.totalorder %s39_s27, 2  ;;  %s42_s17 = sadd.s32 1, %s1845_s14 }
  0xc9   : > { %s51_s18 = sadd.s32 1, %s1829_s10  ;;  %p58_p1 = scmp.ne.s32.totalorder %s1829_s10, %s1825_s9 }
  0xca   : > { %s2523_s27 = smov (%p40_p7, %s39_s27), 0  ;;  %s2525_s17 = smov (!%p40_p7, %s42_s17), %s1845_s14 }
  0xcb   : > { %s47_s20 = ssub.s32 %s1841_s13, %s2523_s27  ;;  %p2443_p3 = scmp.eq.s32.totalorder %s1849_s15, 0 }
  0xcc   : > { %p44_p11 = scmp.ge.s32.totalorder %s2525_s17, 2  ;;  %p64_p12 = scmp.ne.s32.totalorder %s1825_s9, %s1821_s30 }
  0xcd   : > { %p2153_p5 = por %p2443_p3, %p58_p1  ;;  %p242_p13 = scmp.eq.s32.totalorder %s1971_s16, 3 }
  0xce   : > { %s2527_s17 = smov (%p44_p11, %s2525_s17), 0  ;;  %p2472_p0 = scmp.eq.s32.totalorder %s1971_s16, 0 }
  0xcf   : > { %2471 = sst [smem:[#allocation29_spill]] %s2527_s17  ;;  %p2166_p4 = por %p242_p13, %p58_p1 }
  0xd0   : > { %p2162_p2 = por %p2472_p0, %p64_p12  ;;  %s2172_s8 = ssub.s32 %s1845_s14, %s2527_s17 }
  0xd1   : > { %s2474_s23 = scalar_select %p2166_p4, 1, 0 }
  0xd2   : > { %p248_p6 = scmp.eq.s32.totalorder %s1159_s2, 3  ;;  %s48_s19 = sor.u32 %s47_s20, %s2172_s8 }
  0xd3   : > { %p49_p9 = scmp.eq.s32.totalorder %s48_s19, 0  ;;  %p2442_p7 = scmp.lt.s32.totalorder %s1849_s15, 4 }
  0xd4   : > { %p2176_p10 = por %p248_p6, %p64_p12  ;;  %s346_s28 = sand.u32 1, %s1829_s10  }
  0xd5   : > { %s2183_s24 = scalar_select %p49_p9, %s1829_s10, %s51_s18  }
  0xd6   : > { %s2475_s26 = scalar_select %p2176_p10, 1, 0 }
  0xd7   : > { %s1168_s12 = sshll.u32 %s346_s28, 4  ;;  %s1169_s22 = sshll.u32 %s1845_s14, 3 }
  0xd8   : > { %s355_s11 = sadd.s32 %s1841_s13, %s1169_s22  ;;  %s350_s25 = scalar_lea.vmem [#allocation2], %s1168_s12 }
  0xd9   : > { %s358_s3 = sshll.u32 %s350_s25, 4  ;;  %s1170_s4 = sshll.u32 %s355_s11, 6  ;;  %s2187_s3 = int_to_ptr.vmem [resolvable:$true] %s358_s3 }
  0xda   : > { %s2476_s0 = sld [smem:[#allocation30_spill]]  ;;  %p2198_p1 = pnand %p2442_p7, %p2153_p5 }
  0xdb   : > { %s2202_s11 = scalar_lea.sflag [#allocation3], %s346_s28 }
  0xdc   : > { %p1649_p12 = pneg %p2198_p1 }
  0xe0   : > { %s2192_s19 = scalar_lea.hbm %s2476_s0, %s1170_s4  ;;  %s1652_s12 = scalar_lea.hbm %s2476_s0, 1024 }
  0xe1   : > { %s1647_s25 = scalar_lea.hbm %s2192_s19, 256  ;;  %p1653_p5 = scmp.lt.u32.totalorder %s2192_s19, %s2476_s0 }
  0xe2   : > { %p1648_p11 = scmp.ne.s32.totalorder %s2192_s19, %s1647_s25  ;;  %p1654_p6 = scmp.lt.u32.totalorder %s1652_s12, %s1647_s25 }
  0xe3   : > { %p1656_p7 = scmp.lt.u32.totalorder %s1647_s25, %s2192_s19 }
  0xe4   : > { %p1650_p13 = pnand %p1649_p12, %p1648_p11  ;;  %p1655_p9 = por %p1654_p6, %p1653_p5 }
  0xe6   : > { %p1651_p0 = pneg %p1650_p13  ;;  %p1657_p3 = por %p1656_p7, %p1655_p9 }
  0xe8   : > { %p1658_p8 = pnand %p1657_p3, %p1651_p0 }
  0xea   : > { %1661 = shalt.err (!%p1658_p8)
}
  0xeb   : > { %s1662_s28 = scalar_lea.vmem %s2187_s3, 256  ;;  %s1861_s20 = smov [#allocation2]  }
  0xec   : > { %p1663_p11 = scmp.ne.s32.totalorder %s2187_s3, %s1662_s28  ;;  %s1667_s4 = sshll.u32 %s1861_s20, 4  ;;  %s1668_s4 = int_to_ptr.vmem [resolvable:$false] %s1667_s4 }
  0xed   : > { %s1669_s22 = scalar_lea.vmem %s1668_s4, 512  ;;  %p1670_p4 = scmp.lt.s32.totalorder %s2187_s3, %s1668_s4 }
  0xee   : > { %p1665_p13 = pnand %p1663_p11, %p1649_p12  ;;  %p1671_p5 = scmp.lt.s32.totalorder %s1669_s22, %s1662_s28 }
  0xf0   : > { %p1666_p10 = pneg %p1665_p13  ;;  %p1672_p6 = por %p1671_p5, %p1670_p4 }
  0xf2   : > { %p1673_p7 = pnand %p1672_p6, %p1666_p10 }
  0xf4   : > { %1676 = shalt.err (!%p1673_p7)
}
  0xf5   : > { %s2478_s25 = smov 4   ;;  %s2479_s12 = smov 64  }
  0xf6   : > { %s2480_s1 = smov 128   ;;  %s2481_s2 = sld [smem:[#allocation25_spill]] }
  0xf7   : > { %s2482_s20 = sld [smem:[#allocation24_spill]]  ;;  %s77_s18 = sadd.s32 1, %s1817_s29 }
  0xf8   : > { %1316 = dma.hbm_to_vmem [thread:$0]  (!%p2198_p1), %s2192_s19, 256, %s2187_s3, %s2202_s11, %s2480_s1, %s2479_s12, %s2478_s25  }
  0xf9   : > { %p2483_p3 = scmp.eq.s32.totalorder %s2172_s8, 0  ;;  %s368_s4 = sand.u32 1, %s1849_s15  }
  0xfa   : > { %s370_s22 = sand.u32 1, %s1817_s29   ;;  %p2484_p10 = scmp.eq.s32.totalorder %s1849_s15, 0 }
  0xfb   : > { %s2237_s28 = scalar_select %p2483_p3, %s1817_s29, %s77_s18  }
  0xfc   : > { %p84_p4 = scmp.ne.s32.totalorder %s1817_s29, %s2481_s2  ;;  %p2485_p0 = scmp.eq.s32.totalorder %s1971_s16, 0 }
  0xfd   : > { %p90_p8 = scmp.ne.s32.totalorder %s2481_s2, %s2482_s20  ;;  %s1171_s5 = sshll.u32 %s370_s22, 4 }
  0xfe   : > { %p86_p12 = por %p84_p4, %p2484_p10  ;;  %s1209_s6 = sshll.u32 %s1845_s14, 8 }
  0xff   : > { %p2249_p9 = por %p90_p8, %p2485_p0  ;;  %s2487_s3 = sld [smem:[#allocation31_spill]] }
 0x100   : > { %s372_s8 = scalar_lea.vmem [#allocation5], %s1171_s5  ;;  %p2488_p1 = scmp.lt.s32.totalorder %s1849_s15, 4 }
 0x101   : > { %s2486_s0 = scalar_select %p2249_p9, 1, 0 }
 0x102   : > { %s379_s11 = sshll.u32 %s372_s8, 4  ;;  %p2263_p11 = pnand %p2488_p1, %p86_p12  ;;  %s2259_s11 = int_to_ptr.vmem [resolvable:$true] %s379_s11 }
 0x103   : > { %s2267_s12 = scalar_lea.sflag [#allocation6], %s368_s4 }
 0x104   : > { %p1679_p5 = pneg %p2263_p11 }
 0x105   : > { %s2257_s19 = scalar_lea.hbm %s2487_s3, %s1209_s6  ;;  %s1682_s17 = scalar_lea.hbm %s2487_s3, 512 }
 0x106   : > { %s1677_s7 = scalar_lea.hbm %s2257_s19, 256  ;;  %p1683_p3 = scmp.lt.u32.totalorder %s2257_s19, %s2487_s3 }
 0x107   : > { %p1678_p13 = scmp.ne.s32.totalorder %s2257_s19, %s1677_s7  ;;  %p1684_p4 = scmp.lt.u32.totalorder %s1682_s17, %s1677_s7 }
 0x108   : > { %p1686_p10 = scmp.lt.u32.totalorder %s1677_s7, %s2257_s19 }
 0x109   : > { %p1680_p6 = pnand %p1679_p5, %p1678_p13  ;;  %p1685_p8 = por %p1684_p4, %p1683_p3 }
 0x10b   : > { %p1681_p7 = pneg %p1680_p6  ;;  %p1687_p12 = por %p1686_p10, %p1685_p8 }
 0x10d   : > { %p1688_p0 = pnand %p1687_p12, %p1681_p7 }
 0x10f   : > { %1691 = shalt.err (!%p1688_p0)
}
 0x110   : > { %s1692_s18 = scalar_lea.vmem %s2259_s11, 256  ;;  %s1862_s4 = smov [#allocation5]  }
 0x111   : > { %p1693_p1 = scmp.ne.s32.totalorder %s2259_s11, %s1692_s18  ;;  %s1697_s22 = sshll.u32 %s1862_s4, 4  ;;  %s1698_s22 = int_to_ptr.vmem [resolvable:$false] %s1697_s22 }
 0x112   : > { %s1699_s8 = scalar_lea.vmem %s1698_s22, 512  ;;  %p1700_p9 = scmp.lt.s32.totalorder %s2259_s11, %s1698_s22 }
 0x113   : > { %p1695_p13 = pnand %p1693_p1, %p1679_p5  ;;  %p1701_p3 = scmp.lt.s32.totalorder %s1699_s8, %s1692_s18 }
 0x115   : > { %p1696_p6 = pneg %p1695_p13  ;;  %p1702_p4 = por %p1701_p3, %p1700_p9 }
 0x117   : > { %p1703_p8 = pnand %p1702_p4, %p1696_p6 }
 0x119   : > { %1706 = shalt.err (!%p1703_p8)
}
 0x11a   : > { %s2490_s7 = smov 8   ;;  %s2491_s5 = sld [smem:[#allocation28_spill]] }
 0x11b   : > { %1319 = dma.hbm_to_vmem [thread:$0]  (!%p2263_p11), %s2257_s19, 256, %s2259_s11, %s2267_s12, %s2480_s1, %s2480_s1, %s2490_s7  }
 0x120   : > { %p2492_p5 = scmp.ne.s32.totalorder %s2491_s5, 0 }
 0x121   : > { %s2301_s6 = sand.u32 (!%p2492_p5), 1, %s1825_s9  }
 0x122   : > { %391 = sbr.rel (%p2492_p5) target bundleno = 1291 (0x50b), region = 52  ;;  %s1175_s17 = sshll.u32 (!%p2492_p5), %s2301_s6, 4 }
 0x123   : > { %s394_s2 = scalar_lea.sflag (!%p2492_p5), [#allocation3], %s2301_s6  ;;  %s397_s20 = scalar_lea.vmem (!%p2492_p5), [#allocation2], %s1175_s17 }
 0x129   : > { %1780 = dma.done.wait (%p2162_p2), %s394_s2, 256  }
 0x12a   : > { %1782 = vsyncadd (%p2162_p2), %s394_s2, 4294967040  ;;  %s2493_s25 = sld [smem:[#allocation25_spill]]  ;;  %s402_s1 = sand.u32 1, %s1971_s16  }
 0x12b   : > { %s403_s12 = scalar_lea.sflag [#allocation6], %s402_s1  ;;  %p2494_p9 = scmp.ne.s32.totalorder %s2486_s0, 0 }
 0x130   : > { %s404_s19 = sand.u32 1, %s2493_s25  }
 0x131   : > { %s2311_s11 = sshll.u32 %s404_s19, 4 }
 0x132   : > { %s406_s18 = scalar_lea.vmem [#allocation5], %s2311_s11 }
 0x133   : > { %1784 = dma.done.wait (%p2494_p9), %s403_s12, 256  }
 0x134   : > { %1786 = vsyncadd (%p2494_p9), %s403_s12, 4294967040  ;;  %p2495_p11 = scmp.eq.s32.totalorder %s1971_s16, 0 }
 0x136   : > { %1788 = dma.done.wait (%p2495_p11), [#allocation6], 256   ;;  %p2496_p2 = pmov %p2495_p11 }
 0x138   : > { %1790 = vsyncadd (%p2496_p2), [#allocation6], 4294967040  ;;  %p2497_p7 = pmov %p2496_p2 }
 0x139   : > { %p2498_p10 = pmov %p2496_p2 }
 0x13a   : > { %1792 = dma.done.wait (%p2497_p7), [#allocation9], 384  }
 0x13b   : > { %1794 = vsyncadd (%p2498_p10), [#allocation9], 4294966912  ;;  %p2499_p12 = pmov %p2496_p2 }
 0x13c   : > { %p2500_p0 = pmov %p2496_p2 }
 0x13d   : > { %1796 = dma.done.wait (%p2499_p12), [#allocation12], 512  }
 0x13e   : > { %1798 = vsyncadd (%p2500_p0), [#allocation12], 4294966784  ;;  %p2501_p1 = pmov %p2500_p0 }
 0x13f   : > { %p2502_p13 = pmov %p2500_p0 }
 0x140   : > { %1800 = dma.done.wait (%p2501_p1), [#allocation15], 1792  }
 0x141   : > { %1802 = vsyncadd (%p2502_p13), [#allocation15], 4294965504  ;;  %v1863_v0 = vmov 0   ;;  %v1444_v1 = vld [vmem:[%s397_s20] sm:$0xff]   ;;  %v1445_v2 = vld [vmem:[%s397_s20 + $0x8] sm:$0xff]   ;;  %vm533_vm0 = vcmask 261120  }
 0x142   : > { %1442 = vset.pattern.permute.xlu0 %v1863_v0  ;;  %1443 = vset.pattern.permute.xlu1 %v1863_v0  ;;  %v1446_v3 = vld [vmem:[#allocation7] sm:$0xff]   ;;  %v471_v4 = vld [vmem:[#allocation14 + $0x10] sm:$0xff]  ;;  %v1447_v6 = vld [vmem:[#allocation7 + $0x8] sm:$0xff]   ;;  %vm655_vm1 = vcmask 130048   ;;  %v1864_v61 = vmov 0.0   ;;  %vm1865_vm2 = vmmov 0  }
 0x143   : > { %1226 = vmatprep.subr.bf16.mxu0 %v1444_v1  ;;  %1230 = vmatprep.mubr.msk.bf16.mxu0 %vm533_vm0, %v1446_v3  ;;  %v606_v5 = vld [vmem:[%s406_s18] sm:$0xff]  ;;  %v607_v8 = vld [vmem:[%s406_s18 + $0x8] sm:$0xff]  ;;  %s2503_s0 = sld [smem:[#allocation27_spill]]  ;;  %s2504_s16 = sld [smem:[#allocation26_spill]] }
 0x144   : > { %1227 = vmatpush3.bf16.msra.mxu0 %v1444_v1  ;;  %503 = vperm.xlu0 %1442, %v471_v4   ;;  %v472_v7 = vld [vmem:[#allocation14 + $0x18] sm:$0xff]  ;;  %v473_v9 = vld [vmem:[#allocation14 + $0x20] sm:$0xff]  ;;  %v474_v10 = vld [vmem:[#allocation14 + $0x28] sm:$0xff]  ;;  %s1183_s4 = sshll.u32 %s2301_s6, 5  ;;  %s2505_s20 = sld [smem:[#allocation38_spill]] }
 0x145   : > { %1228 = vmatprep.subr.bf16.mxu0 %v1445_v2  ;;  %610 = vperm.xlu1 %1443, %v606_v5   ;;  %v475_v11 = vld [vmem:[#allocation14 + $0x30] sm:$0xff]  ;;  %v476_v12 = vld [vmem:[#allocation14 + $0x38] sm:$0xff]  ;;  %v469_v13 = vld [vmem:[#allocation14] sm:$0xff]  ;;  %s467_s8 = scalar_lea.vmem [#allocation16], %s1183_s4  ;;  %s976_s1 = scalar_lea.sflag [#allocation4], %s2301_s6 }
 0x146   : > { %v470_v14 = vld [vmem:[#allocation14 + $0x8] sm:$0xff]  ;;  %v477_v15 = vld [vmem:[#allocation14 + $0x40] sm:$0xff]  ;;  %v479_v17 = vld [vmem:[#allocation14 + $0x50] sm:$0xff]  ;;  %s990_s7 = sshll.u32 %s467_s8, 4  ;;  %p2506_p3 = scmp.ne.s32.totalorder %s2474_s23, 0  ;;  %s2354_s7 = int_to_ptr.vmem [resolvable:$true] %s990_s7 }
 0x147   : > { %v478_v16 = vld [vmem:[#allocation14 + $0x48] sm:$0xff]  ;;  %v480_v18 = vld [vmem:[#allocation14 + $0x58] sm:$0xff]  ;;  %v481_v19 = vld [vmem:[#allocation14 + $0x60] sm:$0xff]  ;;  %s1707_s19 = scalar_lea.vmem %s2354_s7, 512  ;;  %s1866_s11 = smov [#allocation16]  }
 0x148   : > { %1229 = vmatpush3.bf16.msra.mxu0 %v1445_v2  ;;  %508 = vperm.xlu0 %1442, %v472_v7   ;;  %v482_v20 = vld [vmem:[#allocation14 + $0x68] sm:$0xff]  ;;  %v1449_v60 = vld [vmem:[#allocation8 + $0x8] sm:$0xff]   ;;  %p1708_p6 = scmp.ne.s32.totalorder %s2354_s7, %s1707_s19  ;;  %s1711_s12 = sshll.u32 %s1866_s11, 4  ;;  %s1712_s12 = int_to_ptr.vmem [resolvable:$false] %s1711_s12 }
 0x149   : > { %615 = vperm.xlu1 %1443, %v607_v8   ;;  %v1448_v21 = vld [vmem:[#allocation8] sm:$0xff]   ;;  %s1205_s21 = sshll.u32 %s2503_s0, 3  ;;  %s1713_s18 = scalar_lea.vmem %s1712_s12, 1024 }
 0x14a   : > { %1236 = vmatprep.mubr.msk.bf16.mxu1 %vm655_vm1, %v1448_v21  ;;  %s987_s22 = sadd.s32 %s2504_s16, %s1205_s21  ;;  %p1709_p4 = pnand %p1708_p6, %p2506_p3 }
 0x14b   : > { %1231 = vmatmul.mubr.msk.bf16.vlgmr.msra.gmra.mrb[0].mxu0 %vm533_vm0, %v1447_v6  ;;  %s1206_s5 = sshll.u32 %s987_s22, 7  ;;  %p1714_p5 = scmp.lt.s32.totalorder %s2354_s7, %s1712_s12 }
 0x14c   : > { %627 = vperm.xlu0 %1442, %v473_v9   ;;  %s2359_s25 = scalar_lea.hbm %s2505_s20, %s1206_s5  ;;  %p1710_p8 = pneg %p1709_p4 }
 0x14d   : > { %632 = vperm.xlu1 %1443, %v474_v10   ;;  %p1715_p9 = scmp.lt.s32.totalorder %s1713_s18, %s1707_s19 }
 0x14f   : > { %p1716_p11 = por %p1715_p9, %p1714_p5 }
 0x150   : > { %637 = vperm.xlu0 %1442, %v475_v11  }
 0x151   : > { %642 = vperm.xlu1 %1443, %v476_v12   ;;  %p1717_p2 = pnand %p1716_p11, %p1710_p8 }
 0x154   : > { %493 = vperm.xlu0 %1442, %v469_v13  }
 0x155   : > { %498 = vperm.xlu1 %1443, %v470_v14  }
 0x158   : > { %733 = vperm.xlu0 %1442, %v477_v15  }
 0x159   : > { %738 = vperm.xlu1 %1443, %v478_v16  }
 0x15c   : > { %933 = vperm.xlu0 %1442, %v479_v17  }
 0x15d   : > { %938 = vperm.xlu1 %1443, %v480_v18  }
 0x160   : > { %943 = vperm.xlu0 %1442, %v481_v19  }
 0x161   : > { %948 = vperm.xlu1 %1443, %v482_v20  }
 0x1c3   : > { %v504_v22 = vpop.permute.xlu0 %503 }
 0x1c4   : > { %v611_v23 = vpop.permute.xlu1 %610 }
 0x1c7   : > { %v509_v24 = vpop.permute.xlu0 %508 }
 0x1c8   : > { %v616_v25 = vpop.permute.xlu1 %615 }
 0x1cb   : > { %v628_v26 = vpop.permute.xlu0 %627 }
 0x1cc   : > { %v633_v27 = vpop.permute.xlu1 %632 }
 0x1cf   : > { %v638_v28 = vpop.permute.xlu0 %637 }
 0x1d0   : > { %v643_v29 = vpop.permute.xlu1 %642 }
 0x1d3   : > { %v494_v30 = vpop.permute.xlu0 %493 }
 0x1d4   : > { %v499_v34 = vpop.permute.xlu1 %498 }
 0x21e   : > { %v1232_v31 = vpop.f32.mrb[0].mxu0 }
 0x21f   : > { %v583_v32 = vadd.f32 %v1232_v31, %v504_v22  ;;  %v574_v33 = vpop.f32.mrb[1].mxu0 }
 0x220   : > { %v575_v35 = vadd.f32 %v574_v33, %v494_v30  ;;  %v1233_v36 = vpop.f32.mrb[2].mxu0 }
 0x221   : > { %v591_v37 = vmul.f32 0.5, %v583_v32  ;;  %v586_v38 = vadd.f32 %v1233_v36, %v509_v24  ;;  %v577_v39 = vpop.f32.mrb[3].mxu0  ;;  %v1450_v24 = vld [vmem:[#allocation10] sm:$0xff]   ;;  %v739_v32 = vpop.permute.xlu1 %738 }
 0x222   : > { %v589_v40 = vmul.f32 0.5, %v575_v35  ;;  %v578_v41 = vadd.f32 %v577_v39, %v499_v34  ;;  %v1453_v39 = vld [vmem:[#allocation13 + $0x8] sm:$0xff]  }
 0x223   : > { %1455 = vtanh.f32 %v591_v37  ;;  %v592_v42 = vmul.f32 0.5, %v586_v38 }
 0x224   : > { %1457 = vtanh.f32 %v589_v40  ;;  %v590_v43 = vmul.f32 0.5, %v578_v41 }
 0x225   : > { %1459 = vtanh.f32 %v592_v42 }
 0x226   : > { %1461 = vtanh.f32 %v590_v43 }
 0x22d   : > { %v1456_v44 = vpop.eup %1455 }
 0x22e   : > { %v1458_v45 = vpop.eup %1457  ;;  %v599_v46 = vadd.f32 1.0, %v1456_v44 }
 0x22f   : > { %v1460_v47 = vpop.eup %1459  ;;  %v597_v48 = vadd.f32 1.0, %v1458_v45  ;;  %v939_v45 = vpop.permute.xlu1 %938 }
 0x230   : > { %v1462_v49 = vpop.eup %1461  ;;  %v603_v50 = vmul.f32 %v599_v46, %v591_v37  ;;  %v600_v51 = vadd.f32 1.0, %v1460_v47 }
 0x231   : > { %v598_v52 = vadd.f32 1.0, %v1462_v49  ;;  %v601_v54 = vmul.f32 %v597_v48, %v589_v40 }
 0x232   : > { %v604_v53 = vmul.f32 %v600_v51, %v592_v42  ;;  %v2337_v56 = vmul.f32 %v611_v23, %v603_v50 }
 0x233   : > { %v602_v55 = vmul.f32 %v598_v52, %v590_v43 }
 0x234   : > { %v2339_v57 = vmul.f32 %v616_v25, %v604_v53  ;;  %v1452_v25 = vld [vmem:[#allocation11] sm:$0xff]  }
 0x235   : > { %v605_v58 = vpack.c.bf16 %v602_v55, %v601_v54  ;;  %1256 = vmatprep.mubr.msk.bf16.mxu0 %vm655_vm1, %v1452_v25  ;;  %v949_v55 = vpop.permute.xlu1 %948 }
 0x236   : > { %v624_v59 = vpack.c.bf16 %v2339_v57, %v2337_v56 }
 0x237   : > { %1254 = vmatprep.subr.bf16.mxu0 %v605_v58 }
 0x238   : > { %1234 = vmatprep.subr.bf16.mxu1 %v624_v59  ;;  %1255 = vmatpush3.bf16.msra.mxu0 %v605_v58 }
 0x239   : > { %1235 = vmatpush3.bf16.msra.mxu1 %v624_v59 }
 0x23a   : > { %1240 = vmatprep.subr.bf16.mxu1 %v1864_v61 }
 0x23c   : > { %1237 = vmatmul.mubr.msk.bf16.vlgmr.msra.gmra.mrb[0].mxu1 %vm655_vm1, %v1449_v60 }
 0x23d   : > { %1244 = vmatprep.mubr.msk.bf16.mxu1 %vm1865_vm2, %v1864_v61 }
 0x30f   : > { %v1238_v62 = vpop.f32.mrb[0].mxu1 }
 0x310   : > { %v705_v63 = vadd.f32 %v1238_v62, %v638_v28  ;;  %v696_v0 = vpop.f32.mrb[1].mxu1  ;;  %v734_v28 = vpop.permute.xlu0 %733 }
 0x311   : > { %v697_v1 = vadd.f32 %v696_v0, %v628_v26  ;;  %v1239_v2 = vpop.f32.mrb[2].mxu1  ;;  %v1454_v26 = vld [vmem:[#allocation11 + $0x8] sm:$0xff]  }
 0x312   : > { %v713_v3 = vmul.f32 0.5, %v705_v63  ;;  %v708_v4 = vadd.f32 %v1239_v2, %v643_v29  ;;  %v699_v5 = vpop.f32.mrb[3].mxu1  ;;  %1257 = vmatmul.mubr.msk.bf16.vlgmr.msra.gmra.mrb[4].mxu0 %vm655_vm1, %v1454_v26 }
 0x313   : > { %v711_v6 = vmul.f32 0.5, %v697_v1  ;;  %v700_v7 = vadd.f32 %v699_v5, %v633_v27  ;;  %v1451_v27 = vld [vmem:[#allocation13] sm:$0xff]  }
 0x314   : > { %1463 = vtanh.f32 %v713_v3  ;;  %v714_v8 = vmul.f32 0.5, %v708_v4  ;;  %v934_v44 = vpop.permute.xlu0 %933 }
 0x315   : > { %1465 = vtanh.f32 %v711_v6  ;;  %v712_v9 = vmul.f32 0.5, %v700_v7 }
 0x316   : > { %1467 = vtanh.f32 %v714_v8 }
 0x317   : > { %1469 = vtanh.f32 %v712_v9 }
 0x318   : > { %v944_v49 = vpop.permute.xlu0 %943 }
 0x31e   : > { %v1464_v10 = vpop.eup %1463 }
 0x31f   : > { %v1466_v11 = vpop.eup %1465  ;;  %v721_v12 = vadd.f32 1.0, %v1464_v10 }
 0x320   : > { %v1468_v13 = vpop.eup %1467  ;;  %v719_v14 = vadd.f32 1.0, %v1466_v11 }
 0x321   : > { %v1470_v15 = vpop.eup %1469  ;;  %v722_v16 = vadd.f32 1.0, %v1468_v13  ;;  %v725_v18 = vmul.f32 %v721_v12, %v713_v3 }
 0x322   : > { %v720_v17 = vadd.f32 1.0, %v1470_v15  ;;  %v723_v20 = vmul.f32 %v719_v14, %v711_v6 }
 0x323   : > { %v726_v19 = vmul.f32 %v722_v16, %v714_v8 }
 0x324   : > { %v724_v21 = vmul.f32 %v720_v17, %v712_v9 }
 0x325   : > { %v730_v22 = vpack.c.bf16 %v726_v19, %v725_v18 }
 0x326   : > { %v729_v23 = vpack.c.bf16 %v724_v21, %v723_v20 }
 0x328   : > { %1241 = vmatpush3.bf16.msra.mxu1 %v729_v23 }
 0x329   : > { %1242 = vmatprep.subr.bf16.mxu1 %v1864_v61 }
 0x32c   : > { %1243 = vmatpush3.bf16.msra.mxu1 %v730_v22 }
 0x32f   : > { %1245 = vmatmul.mubr.msk.bf16.vlgmr.msra.gmra.mrb[4].mxu1 %vm533_vm0, %v1450_v24 }
 0x330   : > { %1250 = vmatprep.mubr.msk.bf16.mxu1 %vm655_vm1, %v1451_v27 }
 0x3e5   : > { %v1258_v40 = vpop.f32.mrb[4].mxu0 }
 0x3e6   : > { %v916_v41 = vpop.f32.mrb[5].mxu0 }
 0x3e7   : > { %v1259_v42 = vpop.f32.mrb[6].mxu0 }
 0x3e8   : > { %v919_v43 = vpop.f32.mrb[7].mxu0 }
 0x402   : > { %v783_v29 = vpop.f32.mrb[4].mxu1 }
 0x403   : > { %v784_v30 = vadd.f32 %v783_v29, %v734_v28  ;;  %v1246_v31 = vpop.f32.mrb[5].mxu1 }
 0x404   : > { %v786_v33 = vpop.f32.mrb[6].mxu1 }
 0x405   : > { %v787_v34 = vadd.f32 %v786_v33, %v739_v32  ;;  %v1247_v35 = vpop.f32.mrb[7].mxu1  ;;  %v790_v36 = vadd.f32 %v784_v30, %v2337_v56 }
 0x407   : > { %v791_v37 = vadd.f32 %v787_v34, %v2339_v57 }
 0x409   : > { %v792_v38 = vpack.c.bf16 %v791_v37, %v790_v36 }
 0x40b   : > { %1248 = vmatprep.subr.bf16.mxu1 %v792_v38 }
 0x40c   : > { %1249 = vmatpush3.bf16.msra.mxu1 %v792_v38 }
 0x40f   : > { %1251 = vmatmul.mubr.msk.bf16.vlgmr.msra.gmra.mrb[8].mxu1 %vm655_vm1, %v1453_v39 }
 0x4e2   : > { %v1252_v46 = vpop.f32.mrb[8].mxu1 }
 0x4e3   : > { %v925_v47 = vadd.f32 %v1258_v40, %v1252_v46  ;;  %v851_v48 = vpop.f32.mrb[9].mxu1 }
 0x4e4   : > { %v917_v50 = vadd.f32 %v916_v41, %v851_v48  ;;  %v1253_v51 = vpop.f32.mrb[10].mxu1 }
 0x4e5   : > { %v953_v52 = vadd.f32 %v944_v49, %v925_v47  ;;  %v928_v53 = vadd.f32 %v1259_v42, %v1253_v51  ;;  %v854_v54 = vpop.f32.mrb[11].mxu1 }
 0x4e6   : > { %v951_v56 = vadd.f32 %v934_v44, %v917_v50  ;;  %v920_v57 = vadd.f32 %v919_v43, %v854_v54 }
 0x4e7   : > { %v957_v58 = vmul.f32 0.5, %v953_v52  ;;  %v954_v59 = vadd.f32 %v949_v55, %v928_v53 }
 0x4e8   : > { %v955_v60 = vmul.f32 0.5, %v951_v56  ;;  %v952_v61 = vadd.f32 %v939_v45, %v920_v57 }
 0x4e9   : > { %1471 = vtanh.f32 %v957_v58  ;;  %v958_v62 = vmul.f32 0.5, %v954_v59 }
 0x4ea   : > { %1473 = vtanh.f32 %v955_v60  ;;  %v956_v63 = vmul.f32 0.5, %v952_v61 }
 0x4eb   : > { %1475 = vtanh.f32 %v958_v62 }
 0x4ec   : > { %1477 = vtanh.f32 %v956_v63 }
 0x4f3   : > { %v1472_v0 = vpop.eup %1471 }
 0x4f4   : > { %v1474_v1 = vpop.eup %1473  ;;  %v965_v2 = vadd.f32 1.0, %v1472_v0 }
 0x4f5   : > { %v1476_v3 = vpop.eup %1475  ;;  %v963_v4 = vadd.f32 1.0, %v1474_v1 }
 0x4f6   : > { %v1478_v5 = vpop.eup %1477  ;;  %v969_v6 = vmul.f32 %v965_v2, %v957_v58  ;;  %v966_v7 = vadd.f32 1.0, %v1476_v3 }
 0x4f7   : > { %v967_v8 = vmul.f32 %v963_v4, %v955_v60  ;;  %v964_v9 = vadd.f32 1.0, %v1478_v5 }
 0x4f8   : > { %973 = vst [vmem:[%s467_s8 + $0x10] sm:$0xff] %v969_v6  ;;  %v970_v10 = vmul.f32 %v966_v7, %v958_v62 }
 0x4f9   : > { %971 = vst [vmem:[%s467_s8] sm:$0xff] %v967_v8  ;;  %v968_v11 = vmul.f32 %v964_v9, %v956_v63 }
 0x4fa   : > { %974 = vst [vmem:[%s467_s8 + $0x18] sm:$0xff] %v970_v10 }
 0x4fb   : > { %972 = vst [vmem:[%s467_s8 + $0x8] sm:$0xff] %v968_v11 }
 0x4fc   : > { %1720 = shalt.err (!%p1717_p2)
}
 0x4fd   : > { %s1721_s0 = scalar_lea.hbm %s2359_s25, 512  ;;  %s1725_s4 = scalar_lea.hbm %s2505_s20, 2048 }
 0x4fe   : > { %p1722_p7 = scmp.ne.s32.totalorder %s2359_s25, %s1721_s0  ;;  %p1726_p0 = scmp.lt.u32.totalorder %s2359_s25, %s2505_s20 }
 0x4ff   : > { %p1727_p1 = scmp.lt.u32.totalorder %s1725_s4, %s1721_s0  ;;  %p1729_p6 = scmp.lt.u32.totalorder %s1721_s0, %s2359_s25 }
 0x500   : > { %p1723_p10 = pnand %p1722_p7, %p2506_p3 }
 0x501   : > { %p1728_p13 = por %p1727_p1, %p1726_p0 }
 0x502   : > { %p1724_p12 = pneg %p1723_p10 }
 0x503   : > { %p1730_p4 = por %p1729_p6, %p1728_p13 }
 0x505   : > { %p1731_p8 = pnand %p1730_p4, %p1724_p12 }
 0x507   : > { %1734 = shalt.err (!%p1731_p8)
}
 0x508   : > { %s1867_s5 = smov 128   ;;  %s1868_s17 = smov 256  }
 0x509   : > { %s1869_s2 = smov 8  }
 0x50a   : > { %1292 = dma.vmem_to_hbm [thread:$0]  (%p2506_p3), %s2354_s7, 512, %s2359_s25, %s976_s1, %s1867_s5, %s1868_s17, %s1869_s2  }
 0x50b PF: > { %p1337_p5 = scmp.ge.s32.totalorder %s1849_s15, 2  ;;  %s1005_s19 = sand.u32 1, %s1821_s30  }
 0x50c   : > { %p2507_p9 = scmp.ne.s32.totalorder %s2475_s26, 0  ;;  %s1006_s11 = scalar_lea.sflag [#allocation4], %s1005_s19 }
 0x50e   : > { %p1321_p11 = pnand %p1337_p5, %p2507_p9 }
 0x510   : > { %1804 = dma.done.wait (!%p1321_p11), %s1006_s11, 512  }
 0x511   : > { %1806 = vsyncadd (!%p1321_p11), %s1006_s11, 4294966784  ;;  %s30_s15 = sadd.s32 1, %s1849_s15   ;;  %s2508_s12 = sld [smem:[#allocation25_spill]] }
 0x512   : > { %p27_p2 = scmp.ge.s32.totalorder %s30_s15, 6   ;;  %s2509_s18 = smov %s2237_s28 }
 0x513   : > { %s2510_s23 = smov %s2523_s27  ;;  %s2511_s6 = sld [smem:[#allocation29_spill]] }
 0x514   : > { %s2513_s28 = smov %s1817_s29  ;;  %s2514_s29 = smov %s2509_s18 }
 0x515   : > { %s2515_s30 = smov %s1825_s9  ;;  %s2516_s9 = smov %s1829_s10 }
 0x516   : > { %s2517_s10 = smov %s2183_s24  ;;  %s2518_s11 = smov %s1841_s13 }
 0x517   : > { %s2512_s27 = smov %s2508_s12  ;;  %s2519_s12 = smov %s1845_s14 }
 0x518   : > { %s2520_s13 = smov %s2510_s23  ;;  %29 = sbr.rel (!%p27_p2) target bundleno = 24 (0x18), region = 134 }
 0x519   : > { %s2521_s14 = smov %s2511_s6 }
 0x51f   :  { %1011 = vsyncpa [#allocation3], 1 }
 0x520   :  { %1013 = vsyncpa [#allocation3 + $0x1], 1 }
 0x521   :  { %1014 = vsyncpa [#allocation6], 1 }
 0x522   :  { %1016 = vsyncpa [#allocation6 + $0x1], 1 }
 0x523   :  { %1017 = vsyncpa [#allocation9], 1 }
 0x524   :  { %1018 = vsyncpa [#allocation12], 1 }
 0x525   :  { %1019 = vsyncpa [#allocation15], 1 }
 0x526   :  { %1020 = vsyncpa [#allocation4], 1 }
 0x527   :  { %1022 = vsyncpa [#allocation4 + $0x1], 1 }

</bundles_post_ra>
